<compile_context>
chip_gen: v6e
topology: v6e:2x2x1
jax: 0.10.0
libtpu: 0.0.40
codegen_flags: <defaults>
</compile_context>

<pallas_src>
import math

import jax
import jax.numpy as jnp
from jax.experimental import pallas as pl
from jax.experimental.pallas import tpu as pltpu

# Logical and 128-padded layer widths.
H1, H1P = 784, 896      # fc1 out, padded
H2 = 512                # fc2 out (already aligned)
H3, H3P = 64, 128       # fc3 out, padded
OUT, OUTP = 5, 128      # final out, padded


def dqn_kernel(x_ref, w1_ref, w2_ref, w3_ref, w4_ref, b_ref, o_ref):
    # x_ref: (TB, IN) f32 -> cast to bf16 in-kernel (saves a wrapper HBM pass).
    # w*_ref: bf16 padded weights; b_ref: (4, H1P) f32 packed biases.
    x = x_ref[...].astype(jnp.bfloat16)
    # fc1 + relu  (bf16 MXU inputs, f32 accumulate, bias/relu in f32)
    h = jnp.dot(x, w1_ref[...], preferred_element_type=jnp.float32)
    h = jnp.maximum(h + b_ref[0:1, :H1P], 0.0)
    # fc2 + relu
    h = jnp.dot(h.astype(jnp.bfloat16), w2_ref[...],
                preferred_element_type=jnp.float32)
    h = jnp.maximum(h + b_ref[1:2, :H2], 0.0)
    # fc3 + relu
    h = jnp.dot(h.astype(jnp.bfloat16), w3_ref[...],
                preferred_element_type=jnp.float32)
    h = jnp.maximum(h + b_ref[2:3, :H3P], 0.0)
    # out + relu  (padded to 128 lanes -> unmasked vst; padded lanes stay 0)
    h = jnp.dot(h.astype(jnp.bfloat16), w4_ref[...],
                preferred_element_type=jnp.float32)
    h = jnp.maximum(h + b_ref[3:4, :OUTP], 0.0)
    o_ref[...] = h.astype(o_ref.dtype)   # bf16 writeback (halves output bytes)


def init_linear(key, fan_in, fan_out):
    """PyTorch-style init U(-1/sqrt(fan_in), 1/sqrt(fan_in)).
    Weight stored transposed (fan_in, fan_out); bias (fan_out,)."""
    kw, kb = jax.random.split(key)
    bound = 1.0 / math.sqrt(fan_in)
    w = jax.random.uniform(kw, (fan_in, fan_out), jnp.float32, -bound, bound)
    b = jax.random.uniform(kb, (fan_out,), jnp.float32, -bound, bound)
    return w, b


def _pad2(a, rows, cols):
    return jnp.pad(a, ((0, rows - a.shape[0]), (0, cols - a.shape[1])))


def prepare_params(raw_params):
    """Pad weights/biases to 128-aligned shapes (zero padding keeps results
    exact through ReLU), cast weights to bf16, pack biases into one f32 array."""
    (w1, b1), (w2, b2), (w3, b3), (w4, b4) = raw_params
    in_f = w1.shape[0]
    w1p = _pad2(w1, in_f, H1P).astype(jnp.bfloat16)   # (768, 896)
    w2p = _pad2(w2, H1P, H2).astype(jnp.bfloat16)     # (896, 512) zero rows 784:
    w3p = _pad2(w3, H2, H3P).astype(jnp.bfloat16)     # (512, 128)
    w4p = _pad2(w4, H3P, OUTP).astype(jnp.bfloat16)   # (128, 128) zero rows 64:
    b_pack = jnp.stack([
        jnp.pad(b1, (0, H1P - b1.shape[0])),
        jnp.pad(b2, (0, H1P - b2.shape[0])),
        jnp.pad(b3, (0, H1P - b3.shape[0])),
        jnp.pad(b4, (0, H1P - b4.shape[0])),
    ]).astype(jnp.float32)                            # (4, 896)
    return w1p, w2p, w3p, w4p, b_pack


def _pick_batch_tile(B):
    """Batch tile selection per perf review:
    - B <= 128: single tile, rounded to a multiple of 16 (bf16 sublane pack).
    - 128 < B <= 512: TB=128 so the grid has >=2 tiles (feeds both v7x TCs).
    - larger B: TB=256/512 to amortize per-grid-step overhead, still >=2 tiles.
    """
    if B <= 128:
        return ((B + 15) // 16) * 16
    if B >= 1024:
        return 512
    if B > 512:
        return 256
    return 128


def dqn_forward(x_nchw, prepared):
    """x_nchw: (B, 3, H, W) f32. Returns (B, 5) f32."""
    w1p, w2p, w3p, w4p, b_pack = prepared
    B = x_nchw.shape[0]
    in_f = w1p.shape[0]

    # Glue: PyTorch-equivalent flatten(start_dim=1) -> (B, 3*H*W), kept in f32;
    # the bf16 cast happens inside the kernel.
    x = x_nchw.reshape(B, -1)
    assert x.shape[1] == in_f, (x.shape, in_f)

    TB = _pick_batch_tile(B)
    B_pad = ((B + TB - 1) // TB) * TB
    if B_pad != B:
        x = jnp.pad(x, ((0, B_pad - B), (0, 0)))

    grid = (B_pad // TB,)

    flops = 2 * B_pad * (in_f * H1P + H1P * H2 + H2 * H3P + H3P * OUTP)
    bytes_accessed = (x.size * 4                                       # f32 input
                      + 2 * (w1p.size + w2p.size + w3p.size + w4p.size)  # bf16 weights
                      + 4 * b_pack.size                                # f32 biases
                      + 2 * B_pad * OUTP)                              # bf16 output

    resident = pl.Buffered(1)   # grid-constant blocks: no double-buffering
    out_padded = pl.pallas_call(
        dqn_kernel,
        out_shape=jax.ShapeDtypeStruct((B_pad, OUTP), jnp.bfloat16),
        grid=grid,
        in_specs=[
            pl.BlockSpec((TB, in_f), lambda i: (i, 0)),                 # x: batch-tiled
            pl.BlockSpec((in_f, H1P), lambda i: (0, 0), pipeline_mode=resident),
            pl.BlockSpec((H1P, H2),   lambda i: (0, 0), pipeline_mode=resident),
            pl.BlockSpec((H2, H3P),   lambda i: (0, 0), pipeline_mode=resident),
            pl.BlockSpec((H3P, OUTP), lambda i: (0, 0), pipeline_mode=resident),
            pl.BlockSpec((4, H1P),    lambda i: (0, 0), pipeline_mode=resident),
        ],
        out_specs=pl.BlockSpec((TB, OUTP), lambda i: (i, 0)),
        compiler_params=pltpu.CompilerParams(
            dimension_semantics=("parallel",)),            # megacore on v7x
        cost_estimate=pl.CostEstimate(flops=flops, transcendentals=0,
                                      bytes_accessed=bytes_accessed),
    )(x, w1p, w2p, w3p, w4p, b_pack)

    return out_padded[:B, :OUT].astype(jnp.float32)


def reference_forward(x_nchw, prepared):
    """Same math as the kernel (bf16 weights/acts, f32 accumulation, bf16 out)."""
    w1p, w2p, w3p, w4p, b_pack = prepared
    h = x_nchw.reshape(x_nchw.shape[0], -1).astype(jnp.bfloat16)
    h = jnp.maximum(jnp.dot(h, w1p, preferred_element_type=jnp.float32)
                    + b_pack[0:1, :H1P], 0.0)
    h = jnp.maximum(jnp.dot(h.astype(jnp.bfloat16), w2p,
                            preferred_element_type=jnp.float32)
                    + b_pack[1:2, :H2], 0.0)
    h = jnp.maximum(jnp.dot(h.astype(jnp.bfloat16), w3p,
                            preferred_element_type=jnp.float32)
                    + b_pack[2:3, :H3P], 0.0)
    h = jnp.maximum(jnp.dot(h.astype(jnp.bfloat16), w4p,
                            preferred_element_type=jnp.float32)
                    + b_pack[3:4, :OUTP], 0.0)
    return h.astype(jnp.bfloat16)[:, :OUT].astype(jnp.float32)


if __name__ == "__main__":
    img_height, img_width = 16, 16
    batch = 2

    key = jax.random.PRNGKey(0)
    k_in, k1, k2, k3, k4 = jax.random.split(key, 5)

    in_features = img_height * img_width * 3  # 768
    raw_params = (
        init_linear(k1, in_features, H1),
        init_linear(k2, H1, H2),
        init_linear(k3, H2, H3),
        init_linear(k4, H3, OUT),
    )
    prepared = prepare_params(raw_params)

    x = jax.random.normal(k_in, (batch, 3, img_height, img_width), jnp.float32)

    out = jax.block_until_ready(dqn_forward(x, prepared))
    assert out.shape == (batch, OUT), out.shape

    # Exact-math reference (same bf16 weights/acts, f32 accumulation, bf16 out).
    ref = reference_forward(x, prepared)
    assert jnp.allclose(out, ref, atol=1e-2, rtol=1e-2), "mismatch vs bf16 reference"

    # Loose sanity check vs pure-f32, unpadded math (bf16 shifts by ~1e-2 rel).
    f32_ref = x.reshape(batch, -1)
    for w, b in raw_params:
        f32_ref = jnp.maximum(f32_ref @ w + b, 0.0)
    assert jnp.allclose(out, f32_ref, atol=1e-1, rtol=1e-1), "mismatch vs f32 reference"

    print("KERNEL_OK")
</pallas_src>

<mosaic_0001>
module attributes {stable_mosaic.version = 11 : i64} {
  func.func @dqn_kernel(%arg0: i32, %arg1: memref<16x768xf32, #tpu.memory_space<vmem>>, %arg2: memref<768x896xbf16, #tpu.memory_space<vmem>>, %arg3: memref<896x512xbf16, #tpu.memory_space<vmem>>, %arg4: memref<512x128xbf16, #tpu.memory_space<vmem>>, %arg5: memref<128x128xbf16, #tpu.memory_space<vmem>>, %arg6: memref<4x896xf32, #tpu.memory_space<vmem>>, %arg7: memref<16x128xbf16, #tpu.memory_space<vmem>>) attributes {dimension_semantics = [#tpu.dimension_semantics<parallel>], iteration_bounds = array<i64: 1>, scalar_prefetch = 0 : i64, scratch_operands = 0 : i64, tpu.core_type = #tpu.core_type<tc>, window_params = [{transform_indices = @transform_0, window_bounds = array<i64: 16, 768>}, {pipeline_mode = #tpu.pipeline_mode<synchronous>, transform_indices = @transform_1, window_bounds = array<i64: 768, 896>}, {pipeline_mode = #tpu.pipeline_mode<synchronous>, transform_indices = @transform_2, window_bounds = array<i64: 896, 512>}, {pipeline_mode = #tpu.pipeline_mode<synchronous>, transform_indices = @transform_3, window_bounds = array<i64: 512, 128>}, {pipeline_mode = #tpu.pipeline_mode<synchronous>, transform_indices = @transform_4, window_bounds = array<i64: 128, 128>}, {pipeline_mode = #tpu.pipeline_mode<synchronous>, transform_indices = @transform_5, window_bounds = array<i64: 4, 896>}, {transform_indices = @transform_6, window_bounds = array<i64: 16, 128>}]} {
    %c0 = arith.constant 0 : index
    %c0_0 = arith.constant 0 : index
    %0 = vector.load %arg1[%c0, %c0_0] : memref<16x768xf32, #tpu.memory_space<vmem>>, vector<16x768xf32>
    %1 = arith.truncf %0 : vector<16x768xf32> to vector<16x768xbf16>
    %c0_1 = arith.constant 0 : index
    %c0_2 = arith.constant 0 : index
    %2 = vector.load %arg2[%c0_1, %c0_2] : memref<768x896xbf16, #tpu.memory_space<vmem>>, vector<768x896xbf16>
    %cst = arith.constant dense<0.000000e+00> : vector<16x896xf32>
    %3 = tpu.matmul %1, %2, %cst {dimension_numbers = #tpu.dot_dimension_numbers<[1], [0], [0], [1], [0, 0, 1, 1], [], []>} : vector<16x768xbf16>, vector<768x896xbf16>, vector<16x896xf32> -> vector<16x896xf32>
    %c0_3 = arith.constant 0 : index
    %c0_4 = arith.constant 0 : index
    %4 = vector.load %arg6[%c0_3, %c0_4] : memref<4x896xf32, #tpu.memory_space<vmem>>, vector<1x896xf32>
    %5 = vector.broadcast %4 : vector<1x896xf32> to vector<16x896xf32>
    %6 = arith.addf %3, %5 : vector<16x896xf32>
    %cst_5 = arith.constant 0.000000e+00 : f32
    %7 = vector.broadcast %cst_5 : f32 to vector<16x896xf32>
    %8 = arith.maximumf %6, %7 : vector<16x896xf32>
    %9 = arith.truncf %8 : vector<16x896xf32> to vector<16x896xbf16>
    %c0_6 = arith.constant 0 : index
    %c0_7 = arith.constant 0 : index
    %10 = vector.load %arg3[%c0_6, %c0_7] : memref<896x512xbf16, #tpu.memory_space<vmem>>, vector<896x512xbf16>
    %cst_8 = arith.constant dense<0.000000e+00> : vector<16x512xf32>
    %11 = tpu.matmul %9, %10, %cst_8 {dimension_numbers = #tpu.dot_dimension_numbers<[1], [0], [0], [1], [0, 0, 1, 1], [], []>} : vector<16x896xbf16>, vector<896x512xbf16>, vector<16x512xf32> -> vector<16x512xf32>
    %c1 = arith.constant 1 : index
    %c0_9 = arith.constant 0 : index
    %12 = vector.load %arg6[%c1, %c0_9] : memref<4x896xf32, #tpu.memory_space<vmem>>, vector<1x512xf32>
    %13 = vector.broadcast %12 : vector<1x512xf32> to vector<16x512xf32>
    %14 = arith.addf %11, %13 : vector<16x512xf32>
    %cst_10 = arith.constant 0.000000e+00 : f32
    %15 = vector.broadcast %cst_10 : f32 to vector<16x512xf32>
    %16 = arith.maximumf %14, %15 : vector<16x512xf32>
    %17 = arith.truncf %16 : vector<16x512xf32> to vector<16x512xbf16>
    %c0_11 = arith.constant 0 : index
    %c0_12 = arith.constant 0 : index
    %18 = vector.load %arg4[%c0_11, %c0_12] : memref<512x128xbf16, #tpu.memory_space<vmem>>, vector<512x128xbf16>
    %cst_13 = arith.constant dense<0.000000e+00> : vector<16x128xf32>
    %19 = tpu.matmul %17, %18, %cst_13 {dimension_numbers = #tpu.dot_dimension_numbers<[1], [0], [0], [1], [0, 0, 1, 1], [], []>} : vector<16x512xbf16>, vector<512x128xbf16>, vector<16x128xf32> -> vector<16x128xf32>
    %c2 = arith.constant 2 : index
    %c0_14 = arith.constant 0 : index
    %20 = vector.load %arg6[%c2, %c0_14] : memref<4x896xf32, #tpu.memory_space<vmem>>, vector<1x128xf32>
    %21 = vector.broadcast %20 : vector<1x128xf32> to vector<16x128xf32>
    %22 = arith.addf %19, %21 : vector<16x128xf32>
    %cst_15 = arith.constant 0.000000e+00 : f32
    %23 = vector.broadcast %cst_15 : f32 to vector<16x128xf32>
    %24 = arith.maximumf %22, %23 : vector<16x128xf32>
    %25 = arith.truncf %24 : vector<16x128xf32> to vector<16x128xbf16>
    %c0_16 = arith.constant 0 : index
    %c0_17 = arith.constant 0 : index
    %26 = vector.load %arg5[%c0_16, %c0_17] : memref<128x128xbf16, #tpu.memory_space<vmem>>, vector<128x128xbf16>
    %cst_18 = arith.constant dense<0.000000e+00> : vector<16x128xf32>
    %27 = tpu.matmul %25, %26, %cst_18 {dimension_numbers = #tpu.dot_dimension_numbers<[1], [0], [0], [1], [0, 0, 1, 1], [], []>} : vector<16x128xbf16>, vector<128x128xbf16>, vector<16x128xf32> -> vector<16x128xf32>
    %c3 = arith.constant 3 : index
    %c0_19 = arith.constant 0 : index
    %28 = vector.load %arg6[%c3, %c0_19] : memref<4x896xf32, #tpu.memory_space<vmem>>, vector<1x128xf32>
    %29 = vector.broadcast %28 : vector<1x128xf32> to vector<16x128xf32>
    %30 = arith.addf %27, %29 : vector<16x128xf32>
    %cst_20 = arith.constant 0.000000e+00 : f32
    %31 = vector.broadcast %cst_20 : f32 to vector<16x128xf32>
    %32 = arith.maximumf %30, %31 : vector<16x128xf32>
    %33 = arith.truncf %32 : vector<16x128xf32> to vector<16x128xbf16>
    %c0_21 = arith.constant 0 : index
    %c0_22 = arith.constant 0 : index
    %34 = vector.load %arg7[%c0_21, %c0_22] : memref<16x128xbf16, #tpu.memory_space<vmem>>, vector<16x128xbf16>
    tpu.vector_store %arg7[%c0_21, %c0_22], %33 {strides = array<i32>} : memref<16x128xbf16, #tpu.memory_space<vmem>>, vector<16x128xbf16>,
    return
  }
  func.func @transform_0(%arg0: i32) -> (i32, i32) {
    %c0_i32 = arith.constant 0 : i32
    %c0_i32_0 = arith.constant 0 : i32
    return %arg0, %c0_i32 : i32, i32
  }
  func.func @transform_1(%arg0: i32) -> (i32, i32) {
    %c0_i32 = arith.constant 0 : i32
    %c0_i32_0 = arith.constant 0 : i32
    %c0_i32_1 = arith.constant 0 : i32
    return %c0_i32, %c0_i32_0 : i32, i32
  }
  func.func @transform_2(%arg0: i32) -> (i32, i32) {
    %c0_i32 = arith.constant 0 : i32
    %c0_i32_0 = arith.constant 0 : i32
    %c0_i32_1 = arith.constant 0 : i32
    return %c0_i32, %c0_i32_0 : i32, i32
  }
  func.func @transform_3(%arg0: i32) -> (i32, i32) {
    %c0_i32 = arith.constant 0 : i32
    %c0_i32_0 = arith.constant 0 : i32
    %c0_i32_1 = arith.constant 0 : i32
    return %c0_i32, %c0_i32_0 : i32, i32
  }
  func.func @transform_4(%arg0: i32) -> (i32, i32) {
    %c0_i32 = arith.constant 0 : i32
    %c0_i32_0 = arith.constant 0 : i32
    %c0_i32_1 = arith.constant 0 : i32
    return %c0_i32, %c0_i32_0 : i32, i32
  }
  func.func @transform_5(%arg0: i32) -> (i32, i32) {
    %c0_i32 = arith.constant 0 : i32
    %c0_i32_0 = arith.constant 0 : i32
    %c0_i32_1 = arith.constant 0 : i32
    return %c0_i32, %c0_i32_0 : i32, i32
  }
  func.func @transform_6(%arg0: i32) -> (i32, i32) {
    %c0_i32 = arith.constant 0 : i32
    %c0_i32_0 = arith.constant 0 : i32
    return %arg0, %c0_i32 : i32, i32
  }
}

</mosaic_0001>

<bundles_post_ra>
// kernel: tpu_custom_call.1
= control target key start
LH: loop header
LB: loop body
LE: loop exit
PB: predicated region body
PF: predicated region fallthrough
CT: control target
= control target key end

     0   :  { %11 = vsyncpa [#allocation3], 0  ;;  %s7014_s0 = inlined_call_operand.hbm [shape: f32[16,768], index: 0, kind: input, shape index: {}]   ;;  %s7015_s1 = inlined_call_operand.hbm [shape: bf16[768,896], index: 1, kind: input, shape index: {}]   ;;  %s7016_s2 = inlined_call_operand.hbm [shape: bf16[896,512], index: 2, kind: input, shape index: {}]   ;;  %s7017_s3 = inlined_call_operand.hbm [shape: bf16[512,128], index: 3, kind: input, shape index: {}]   ;;  %s7018_s4 = inlined_call_operand.hbm [shape: bf16[128,128], index: 4, kind: input, shape index: {}]   ;;  %s7019_s5 = inlined_call_operand.hbm [shape: f32[4,896], index: 5, kind: input, shape index: {}]   ;;  %s7020_s6 = inlined_call_operand.hbm [shape: bf16[16,128], index: 6, kind: output, shape index: {}]  }
   0x1   :  { %12 = vsyncpa [#allocation6], 0 }
   0x2   :  { %13 = vsyncpa [#allocation9], 0 }
   0x3   :  { %14 = vsyncpa [#allocation12], 0 }
   0x4   :  { %15 = vsyncpa [#allocation4], 0  ;;  %s6789_s21 = smov [#allocation5]  }
   0x5   :  { %s33_s22 = sshll.u32 %s6789_s21, 4  ;;  %s34_s22 = int_to_ptr.vmem [resolvable:$true] %s33_s22 }
   0x6   :  { %s6647_s23 = scalar_lea.vmem %s34_s22, 43008  ;;  %p6652_p1 = scmp.lt.s32.totalorder %s34_s22, %s34_s22 }
   0x7   :  { %p6648_p0 = scmp.ne.s32.totalorder %s34_s22, %s6647_s23  ;;  %p6653_p2 = scmp.lt.s32.totalorder %s6647_s23, %s6647_s23 }
   0x9   :  { %p6654_p3 = por %p6653_p2, %p6652_p1 }
   0xb   :  { %p6655_p4 = pnand %p6654_p3, %p6648_p0 }
   0xd   :  { %6658 = shalt.err (!%p6655_p4)
}
   0xe   :  { %s6790_s24 = smov 448   ;;  %s6791_s25 = smov 28  }
   0xf   :  { %39 = dma.hbm_to_vmem [thread:$0]  %s7015_s1, 43008, %s34_s22, [#allocation6], %s6790_s24, %s6790_s24, %s6791_s25  }
  0x10   :  { %s6792_s28 = smov [#allocation8]  }
  0x11   :  { %s57_s29 = sshll.u32 %s6792_s28, 4  ;;  %s58_s29 = int_to_ptr.vmem [resolvable:$true] %s57_s29 }
  0x12   :  { %s6667_s30 = scalar_lea.vmem %s58_s29, 4096  ;;  %p6672_p6 = scmp.lt.s32.totalorder %s58_s29, %s58_s29 }
  0x13   :  { %p6668_p5 = scmp.ne.s32.totalorder %s58_s29, %s6667_s30  ;;  %p6673_p7 = scmp.lt.s32.totalorder %s6667_s30, %s6667_s30 }
  0x15   :  { %p6674_p8 = por %p6673_p7, %p6672_p6 }
  0x17   :  { %p6675_p9 = pnand %p6674_p8, %p6668_p5 }
  0x19   :  { %6678 = shalt.err (!%p6675_p9)
}
  0x1a   :  { %s6793_s7 = smov 64   ;;  %s6794_s8 = smov 4  }
  0x1b   :  { %63 = dma.hbm_to_vmem [thread:$0]  %s7017_s3, 4096, %s58_s29, [#allocation9], %s6793_s7, %s6793_s7, %s6794_s8  }
  0x1c   :  { %s6795_s1 = smov [#allocation2]  }
  0x1d   :  { %s21_s11 = sshll.u32 %s6795_s1, 4  ;;  %s22_s11 = int_to_ptr.vmem [resolvable:$true] %s21_s11 }
  0x1e   :  { %s6687_s12 = scalar_lea.vmem %s22_s11, 1536  ;;  %p6692_p11 = scmp.lt.s32.totalorder %s22_s11, %s22_s11 }
  0x1f   :  { %p6688_p10 = scmp.ne.s32.totalorder %s22_s11, %s6687_s12  ;;  %p6693_p12 = scmp.lt.s32.totalorder %s6687_s12, %s6687_s12 }
  0x21   :  { %p6694_p13 = por %p6693_p12, %p6692_p11 }
  0x23   :  { %p6695_p0 = pnand %p6694_p13, %p6688_p10 }
  0x25   :  { %6698 = shalt.err (!%p6695_p0)
}
  0x26   :  { %s6796_s13 = smov 768   ;;  %s6797_s14 = smov 48  }
  0x27   :  { %27 = dma.hbm_to_vmem [thread:$0]  %s7014_s0, 1536, %s22_s11, [#allocation3], %s6796_s13, %s6796_s13, %s6797_s14  }
  0x28   :  { %s6798_s17 = smov [#allocation7]  }
  0x29   :  { %s45_s18 = sshll.u32 %s6798_s17, 4  ;;  %s46_s18 = int_to_ptr.vmem [resolvable:$true] %s45_s18 }
  0x2a   :  { %s6707_s3 = scalar_lea.vmem %s46_s18, 28672  ;;  %p6712_p2 = scmp.lt.s32.totalorder %s46_s18, %s46_s18 }
  0x2b   :  { %p6708_p1 = scmp.ne.s32.totalorder %s46_s18, %s6707_s3  ;;  %p6713_p3 = scmp.lt.s32.totalorder %s6707_s3, %s6707_s3 }
  0x2d   :  { %p6714_p4 = por %p6713_p3, %p6712_p2 }
  0x2f   :  { %p6715_p5 = pnand %p6714_p4, %p6708_p1 }
  0x31   :  { %6718 = shalt.err (!%p6715_p5)
}
  0x32   :  { %s6799_s19 = smov 256   ;;  %s6800_s20 = smov 16  }
  0x33   :  { %51 = dma.hbm_to_vmem [thread:$0]  %s7016_s2, 28672, %s46_s18, [#allocation6], %s6799_s19, %s6799_s19, %s6800_s20  }
  0x34   :  { %s6801_s23 = smov [#allocation10]   ;;  %s6802_s25 = smov [#allocation11]  }
  0x35   :  { %s69_s24 = sshll.u32 %s6801_s23, 4  ;;  %s82_s0 = sshll.u32 %s6802_s25, 4  ;;  %s70_s24 = int_to_ptr.vmem [resolvable:$true] %s69_s24  ;;  %s83_s0 = int_to_ptr.vmem [resolvable:$true] %s82_s0 }
  0x36   :  { %s6727_s26 = scalar_lea.vmem %s70_s24, 1024  ;;  %p6732_p7 = scmp.lt.s32.totalorder %s70_s24, %s70_s24 }
  0x37   :  { %p6728_p6 = scmp.ne.s32.totalorder %s70_s24, %s6727_s26  ;;  %p6733_p8 = scmp.lt.s32.totalorder %s6727_s26, %s6727_s26 }
  0x39   :  { %p6734_p9 = por %p6733_p8, %p6732_p7 }
  0x3b   :  { %p6735_p10 = pnand %p6734_p9, %p6728_p6 }
  0x3d   :  { %6738 = shalt.err (!%p6735_p10)
}
  0x3e   :  { %75 = dma.hbm_to_vmem [thread:$0]  %s7018_s4, 1024, %s70_s24, [#allocation9], %s6793_s7, %s6793_s7, %s6794_s8  }
  0x3f   :  { %s6747_s2 = scalar_lea.vmem %s83_s0, 448  ;;  %p6752_p12 = scmp.lt.s32.totalorder %s83_s0, %s83_s0 }
  0x40   :  { %p6748_p11 = scmp.ne.s32.totalorder %s83_s0, %s6747_s2  ;;  %p6753_p13 = scmp.lt.s32.totalorder %s6747_s2, %s6747_s2 }
  0x42   :  { %p6754_p0 = por %p6753_p13, %p6752_p12 }
  0x44   :  { %p6755_p1 = pnand %p6754_p0, %p6748_p11 }
  0x46   :  { %6758 = shalt.err (!%p6755_p1)
}
  0x47   :  { %85 = dma.hbm_to_vmem [thread:$0]  %s7019_s5, 448, %s83_s0, [#allocation12]  }
  0x48   :  { %6779 = dma.done.wait [#allocation3], 1536  }
  0x49   :  { %6780 = vsyncadd [#allocation3], 4294965760 }
  0x4a   :  { %6781 = dma.done.wait [#allocation6], 71680  }
  0x4b   :  { %6782 = vsyncadd [#allocation6], 4294895616 }
  0x4c   :  { %6783 = dma.done.wait [#allocation9], 5120  }
  0x4d   :  { %6784 = vsyncadd [#allocation9], 4294962176 }
  0x4e   :  { %6785 = dma.done.wait [#allocation12], 448  }
  0x4f   :  { %6786 = vsyncadd [#allocation12], 4294966848  ;;  %v5782_v0 = vld [vmem:[#allocation5 + $0x18c] ss:$28 sps:$4 sm:$0xff]   ;;  %v5788_v4 = vld [vmem:[#allocation5 + $0x154] ss:$28 sps:$4 sm:$0xff]  }
  0x50   :  { %v5784_v1 = vld [vmem:[#allocation5 + $0x50c] ss:$28 sps:$4 sm:$0xff]   ;;  %2272 = vmatprep.subr.bf16.mxu0 %v5782_v0  ;;  %v5790_v5 = vld [vmem:[#allocation5 + $0x4d4] ss:$28 sps:$4 sm:$0xff]   ;;  %v5794_v8 = vld [vmem:[#allocation5 + $0x11c] ss:$28 sps:$4 sm:$0xff]  }
  0x51   :  { %v5786_v2 = vld [vmem:[#allocation5 + $0x188] ss:$28 sps:$4 sm:$0xff]   ;;  %2315 = vmatprep.subr.bf16.mxu1 %v5784_v1  ;;  %v5792_v6 = vld [vmem:[#allocation5 + $0x150] ss:$28 sps:$4 sm:$0xff]   ;;  %v5796_v9 = vld [vmem:[#allocation5 + $0x49c] ss:$28 sps:$4 sm:$0xff]  }
  0x52   :  { %v5787_v3 = vld [vmem:[#allocation5 + $0x508] ss:$28 sps:$4 sm:$0xff]   ;;  %2273 = vmatpush1.bf16.msra.mxu0 %v5786_v2  ;;  %v5793_v7 = vld [vmem:[#allocation5 + $0x4d0] ss:$28 sps:$4 sm:$0xff]   ;;  %v5798_v10 = vld [vmem:[#allocation5 + $0x118] ss:$28 sps:$4 sm:$0xff]  }
  0x53   :  { %2316 = vmatpush1.bf16.msra.mxu1 %v5787_v3  ;;  %2274 = vmatprep.subr.bf16.mxu0 %v5788_v4  ;;  %v5799_v11 = vld [vmem:[#allocation5 + $0x498] ss:$28 sps:$4 sm:$0xff]   ;;  %v5800_v12 = vld [vmem:[#allocation5 + $0xe4] ss:$28 sps:$4 sm:$0xff]   ;;  %v5806_v16 = vld [vmem:[#allocation5 + $0xac] ss:$28 sps:$4 sm:$0xff]  }
  0x54   :  { %2317 = vmatprep.subr.bf16.mxu1 %v5790_v5  ;;  %v5802_v13 = vld [vmem:[#allocation5 + $0x464] ss:$28 sps:$4 sm:$0xff]   ;;  %v5808_v17 = vld [vmem:[#allocation5 + $0x42c] ss:$28 sps:$4 sm:$0xff]   ;;  %v5812_v20 = vld [vmem:[#allocation5 + $0x74] ss:$28 sps:$4 sm:$0xff]  }
  0x55   :  { %v5804_v14 = vld [vmem:[#allocation5 + $0xe0] ss:$28 sps:$4 sm:$0xff]   ;;  %v5810_v18 = vld [vmem:[#allocation5 + $0xa8] ss:$28 sps:$4 sm:$0xff]   ;;  %v5814_v21 = vld [vmem:[#allocation5 + $0x3f4] ss:$28 sps:$4 sm:$0xff]  }
  0x56   :  { %2275 = vmatpush1.bf16.msra.mxu0 %v5792_v6  ;;  %v5805_v15 = vld [vmem:[#allocation5 + $0x460] ss:$28 sps:$4 sm:$0xff]   ;;  %v5811_v19 = vld [vmem:[#allocation5 + $0x428] ss:$28 sps:$4 sm:$0xff]   ;;  %v5816_v22 = vld [vmem:[#allocation5 + $0x70] ss:$28 sps:$4 sm:$0xff]  }
  0x57   :  { %2318 = vmatpush1.bf16.msra.mxu1 %v5793_v7  ;;  %2276 = vmatprep.subr.bf16.mxu0 %v5794_v8  ;;  %v5817_v23 = vld [vmem:[#allocation5 + $0x3f0] ss:$28 sps:$4 sm:$0xff]   ;;  %v5818_v24 = vld [vmem:[#allocation5 + $0x3c] ss:$28 sps:$4 sm:$0xff]   ;;  %v5824_v28 = vld [vmem:[#allocation5 + $0x4] ss:$28 sps:$4 sm:$0xff]  }
  0x58   :  { %2319 = vmatprep.subr.bf16.mxu1 %v5796_v9  ;;  %v5820_v25 = vld [vmem:[#allocation5 + $0x3bc] ss:$28 sps:$4 sm:$0xff]   ;;  %v5826_v29 = vld [vmem:[#allocation5 + $0x384] ss:$28 sps:$4 sm:$0xff]   ;;  %v5830_v32 = vld [vmem:[#allocation5 + $0x34c] ss:$28 sps:$4 sm:$0xff]  }
  0x59   :  { %v5822_v26 = vld [vmem:[#allocation5 + $0x38] ss:$28 sps:$4 sm:$0xff]   ;;  %v5828_v30 = vld [vmem:[#allocation5] ss:$28 sps:$4 sm:$0xff]   ;;  %v5832_v33 = vld [vmem:[#allocation5 + $0x6cc] ss:$28 sps:$4 sm:$0xff]  }
  0x5a   :  { %2277 = vmatpush1.bf16.msra.mxu0 %v5798_v10  ;;  %v5823_v27 = vld [vmem:[#allocation5 + $0x3b8] ss:$28 sps:$4 sm:$0xff]   ;;  %v5829_v31 = vld [vmem:[#allocation5 + $0x380] ss:$28 sps:$4 sm:$0xff]   ;;  %v5834_v34 = vld [vmem:[#allocation5 + $0x348] ss:$28 sps:$4 sm:$0xff]  }
  0x5b   :  { %2320 = vmatpush1.bf16.msra.mxu1 %v5799_v11  ;;  %2278 = vmatprep.subr.bf16.mxu0 %v5800_v12  ;;  %v5835_v35 = vld [vmem:[#allocation5 + $0x6c8] ss:$28 sps:$4 sm:$0xff]   ;;  %v5836_v36 = vld [vmem:[#allocation5 + $0x314] ss:$28 sps:$4 sm:$0xff]   ;;  %v5842_v40 = vld [vmem:[#allocation5 + $0x2dc] ss:$28 sps:$4 sm:$0xff]  }
  0x5c   :  { %2321 = vmatprep.subr.bf16.mxu1 %v5802_v13  ;;  %v5838_v37 = vld [vmem:[#allocation5 + $0x694] ss:$28 sps:$4 sm:$0xff]   ;;  %v5844_v41 = vld [vmem:[#allocation5 + $0x65c] ss:$28 sps:$4 sm:$0xff]   ;;  %v5848_v44 = vld [vmem:[#allocation5 + $0x2a4] ss:$28 sps:$4 sm:$0xff]  }
  0x5d   :  { %v5840_v38 = vld [vmem:[#allocation5 + $0x310] ss:$28 sps:$4 sm:$0xff]   ;;  %v5846_v42 = vld [vmem:[#allocation5 + $0x2d8] ss:$28 sps:$4 sm:$0xff]   ;;  %v5850_v45 = vld [vmem:[#allocation5 + $0x624] ss:$28 sps:$4 sm:$0xff]  }
  0x5e   :  { %2279 = vmatpush1.bf16.msra.mxu0 %v5804_v14  ;;  %v5841_v39 = vld [vmem:[#allocation5 + $0x690] ss:$28 sps:$4 sm:$0xff]   ;;  %v5847_v43 = vld [vmem:[#allocation5 + $0x658] ss:$28 sps:$4 sm:$0xff]   ;;  %v5852_v47 = vld [vmem:[#allocation5 + $0x2a0] ss:$28 sps:$4 sm:$0xff]  }
  0x5f   :  { %2322 = vmatpush1.bf16.msra.mxu1 %v5805_v15  ;;  %2280 = vmatprep.subr.bf16.mxu0 %v5806_v16  ;;  %v106_v46 = vld [vmem:[#allocation2 + $0x8] sm:$0xff]  ;;  %v5853_v48 = vld [vmem:[#allocation5 + $0x620] ss:$28 sps:$4 sm:$0xff]   ;;  %v5860_v58 = vld [vmem:[#allocation5 + $0x234] ss:$28 sps:$4 sm:$0xff]   ;;  %vm6805_vm0 = vmmov 0  }
  0x60   :  { %2323 = vmatprep.subr.bf16.mxu1 %v5808_v17  ;;  %v112_v49 = vld [vmem:[#allocation2 + $0x38] sm:$0xff]  ;;  %v114_v52 = vld [vmem:[#allocation2 + $0x48] sm:$0xff]  ;;  %v5862_v59 = vld [vmem:[#allocation5 + $0x5b4] ss:$28 sps:$4 sm:$0xff]   ;;  %s6806_s4 = smov [#allocation13]  }
  0x61   :  { %v6866_v50 = vpack.c.bf16 %v112_v49, %v106_v46  ;;  %v108_v51 = vld [vmem:[#allocation2 + $0x18] sm:$0xff]  ;;  %v5854_v53 = vld [vmem:[#allocation5 + $0x26c] ss:$28 sps:$4 sm:$0xff]   ;;  %v5872_v2 = vld [vmem:[#allocation5 + $0x1c4] ss:$28 sps:$4 sm:$0xff]   ;;  %s4999_s5 = sshll.u32 %s6806_s4, 4  ;;  %s5000_s5 = int_to_ptr.vmem [resolvable:$true] %s4999_s5 }
  0x62   :  { %2281 = vmatpush1.bf16.msra.mxu0 %v5810_v18  ;;  %v5856_v54 = vld [vmem:[#allocation5 + $0x5ec] ss:$28 sps:$4 sm:$0xff]   ;;  %v6868_v55 = vpack.c.bf16 %v114_v52, %v108_v51  ;;  %v5866_v62 = vld [vmem:[#allocation5 + $0x1fc] ss:$28 sps:$4 sm:$0xff]   ;;  %v5874_v3 = vld [vmem:[#allocation5 + $0x544] ss:$28 sps:$4 sm:$0xff]   ;;  %p6764_p3 = scmp.lt.s32.totalorder %s5000_s5, %s5000_s5 }
  0x63   :  { %2324 = vmatpush1.bf16.msra.mxu1 %v5811_v19  ;;  %2282 = vmatprep.subr.bf16.mxu0 %v5812_v20  ;;  %v5858_v56 = vld [vmem:[#allocation5 + $0x268] ss:$28 sps:$4 sm:$0xff]   ;;  %v5864_v60 = vld [vmem:[#allocation5 + $0x230] ss:$28 sps:$4 sm:$0xff]   ;;  %v5868_v63 = vld [vmem:[#allocation5 + $0x57c] ss:$28 sps:$4 sm:$0xff]  }
  0x64   :  { %2325 = vmatprep.subr.bf16.mxu1 %v5814_v21  ;;  %2304 = vmatprep.mubr.bf16.mxu0 %v6866_v50  ;;  %v5859_v57 = vld [vmem:[#allocation5 + $0x5e8] ss:$28 sps:$4 sm:$0xff]   ;;  %v5865_v61 = vld [vmem:[#allocation5 + $0x5b0] ss:$28 sps:$4 sm:$0xff]   ;;  %v5870_v0 = vld [vmem:[#allocation5 + $0x1f8] ss:$28 sps:$4 sm:$0xff]  }
  0x65   :  { %2347 = vmatprep.mubr.bf16.mxu1 %v6868_v55  ;;  %v5871_v1 = vld [vmem:[#allocation5 + $0x578] ss:$28 sps:$4 sm:$0xff]   ;;  %v5876_v4 = vld [vmem:[#allocation5 + $0x1c0] ss:$28 sps:$4 sm:$0xff]   ;;  %v5880_v8 = vld [vmem:[#allocation5 + $0x88c] ss:$28 sps:$4 sm:$0xff]  }
  0x66   :  { %2283 = vmatpush1.bf16.msra.mxu0 %v5816_v22  ;;  %v5877_v5 = vld [vmem:[#allocation5 + $0x540] ss:$28 sps:$4 sm:$0xff]   ;;  %v111_v7 = vld [vmem:[#allocation2 + $0x30] sm:$0xff]  ;;  %v5878_v13 = vld [vmem:[#allocation5 + $0x888] ss:$28 sps:$4 sm:$0xff]   ;;  %s6759_s9 = scalar_lea.vmem %s5000_s5, 128 }
  0x67   :  { %2326 = vmatpush1.bf16.msra.mxu1 %v5817_v23  ;;  %2284 = vmatprep.subr.bf16.mxu0 %v5818_v24  ;;  %v105_v6 = vld [vmem:[#allocation2] sm:$0xff]  ;;  %v107_v9 = vld [vmem:[#allocation2 + $0x10] sm:$0xff]  ;;  %v5889_v17 = vld [vmem:[#allocation5 + $0x15c] ss:$28 sps:$4 sm:$0xff]   ;;  %p6760_p2 = scmp.ne.s32.totalorder %s5000_s5, %s6759_s9  ;;  %p6765_p4 = scmp.lt.s32.totalorder %s6759_s9, %s6759_s9 }
  0x68   :  { %2327 = vmatprep.subr.bf16.mxu1 %v5820_v25  ;;  %v113_v10 = vld [vmem:[#allocation2 + $0x40] sm:$0xff]  ;;  %v5883_v11 = vld [vmem:[#allocation5 + $0x194] ss:$28 sps:$4 sm:$0xff]   ;;  %v6872_v12 = vpack.c.bf16 %v111_v7, %v105_v6  ;;  %v5892_v20 = vld [vmem:[#allocation5 + $0x81c] ss:$28 sps:$4 sm:$0xff]  }
  0x69   :  { %v5881_v14 = vld [vmem:[#allocation5 + $0x190] ss:$28 sps:$4 sm:$0xff]   ;;  %v6874_v15 = vpack.c.bf16 %v113_v10, %v107_v9  ;;  %v5887_v19 = vld [vmem:[#allocation5 + $0x158] ss:$28 sps:$4 sm:$0xff]   ;;  %v5895_v21 = vld [vmem:[#allocation5 + $0x124] ss:$28 sps:$4 sm:$0xff]   ;;  %p6766_p5 = por %p6765_p4, %p6764_p3 }
  0x6a   :  { %2285 = vmatpush1.bf16.msra.mxu0 %v5822_v26  ;;  %v5886_v16 = vld [vmem:[#allocation5 + $0x854] ss:$28 sps:$4 sm:$0xff]   ;;  %v5893_v23 = vld [vmem:[#allocation5 + $0x120] ss:$28 sps:$4 sm:$0xff]   ;;  %v5901_v25 = vld [vmem:[#allocation5 + $0xec] ss:$28 sps:$4 sm:$0xff]  }
  0x6b   :  { %2328 = vmatpush1.bf16.msra.mxu1 %v5823_v27  ;;  %2286 = vmatprep.subr.bf16.mxu0 %v5824_v28  ;;  %v5884_v18 = vld [vmem:[#allocation5 + $0x850] ss:$28 sps:$4 sm:$0xff]   ;;  %v5890_v22 = vld [vmem:[#allocation5 + $0x818] ss:$28 sps:$4 sm:$0xff]   ;;  %v5898_v24 = vld [vmem:[#allocation5 + $0x7e4] ss:$28 sps:$4 sm:$0xff]   ;;  %p6767_p6 = pnand %p6766_p5, %p6760_p2 }
  0x6c   :  { %2329 = vmatprep.subr.bf16.mxu1 %v5826_v29  ;;  %v5896_v26 = vld [vmem:[#allocation5 + $0x7e0] ss:$28 sps:$4 sm:$0xff]   ;;  %v5899_v27 = vld [vmem:[#allocation5 + $0xe8] ss:$28 sps:$4 sm:$0xff]   ;;  %v5907_v29 = vld [vmem:[#allocation5 + $0xb4] ss:$28 sps:$4 sm:$0xff]  }
  0x6d   :  { %v5904_v28 = vld [vmem:[#allocation5 + $0x7ac] ss:$28 sps:$4 sm:$0xff]   ;;  %v5934_v52 = vld [vmem:[#allocation5 + $0xa14] ss:$28 sps:$4 sm:$0xff]   ;;  %v5961_v6 = vld [vmem:[#allocation5 + $0x23c] ss:$28 sps:$4 sm:$0xff]  }
  0x6e   :  { %2287 = vmatpush1.bf16.msra.mxu0 %v5828_v30  ;;  %v5902_v30 = vld [vmem:[#allocation5 + $0x7a8] ss:$28 sps:$4 sm:$0xff]   ;;  %v5929_v51 = vld [vmem:[#allocation5 + $0x350] ss:$28 sps:$4 sm:$0xff]   ;;  %v5964_v9 = vld [vmem:[#allocation5 + $0x8fc] ss:$28 sps:$4 sm:$0xff]  }
  0x6f   :  { %2330 = vmatpush1.bf16.msra.mxu1 %v5829_v31  ;;  %2288 = vmatprep.subr.bf16.mxu0 %v5830_v32  ;;  %v5905_v31 = vld [vmem:[#allocation5 + $0xb0] ss:$28 sps:$4 sm:$0xff]   ;;  %v5923_v46 = vld [vmem:[#allocation5 + $0x8] ss:$28 sps:$4 sm:$0xff]  }
  0x70   :  { %2331 = vmatprep.subr.bf16.mxu1 %v5832_v33  ;;  %v5910_v32 = vld [vmem:[#allocation5 + $0x774] ss:$28 sps:$4 sm:$0xff]   ;;  %v5913_v33 = vld [vmem:[#allocation5 + $0x7c] ss:$28 sps:$4 sm:$0xff]   ;;  %v5926_v49 = vld [vmem:[#allocation5 + $0xa48] ss:$28 sps:$4 sm:$0xff]  }
  0x71   :  { %v5956_v7 = vld [vmem:[#allocation5 + $0x930] ss:$28 sps:$4 sm:$0xff]   ;;  %v5967_v10 = vld [vmem:[#allocation5 + $0x204] ss:$28 sps:$4 sm:$0xff]  }
  0x72   :  { %2289 = vmatpush2.bf16.msra.mxu0 %v5834_v34  ;;  %v5908_v34 = vld [vmem:[#allocation5 + $0x770] ss:$28 sps:$4 sm:$0xff]  }
  0x73   :  { %2332 = vmatpush2.bf16.msra.mxu1 %v5835_v35  ;;  %2290 = vmatprep.subr.bf16.mxu0 %v5836_v36  ;;  %v5911_v35 = vld [vmem:[#allocation5 + $0x78] ss:$28 sps:$4 sm:$0xff]  }
  0x74   :  { %2333 = vmatprep.subr.bf16.mxu1 %v5838_v37  ;;  %v5916_v36 = vld [vmem:[#allocation5 + $0x73c] ss:$28 sps:$4 sm:$0xff]   ;;  %v5919_v37 = vld [vmem:[#allocation5 + $0x44] ss:$28 sps:$4 sm:$0xff]  }
  0x76   :  { %2291 = vmatpush2.bf16.msra.mxu0 %v5840_v38  ;;  %v5914_v38 = vld [vmem:[#allocation5 + $0x738] ss:$28 sps:$4 sm:$0xff]  }
  0x77   :  { %2334 = vmatpush2.bf16.msra.mxu1 %v5841_v39  ;;  %2292 = vmatprep.subr.bf16.mxu0 %v5842_v40  ;;  %v5917_v39 = vld [vmem:[#allocation5 + $0x40] ss:$28 sps:$4 sm:$0xff]  }
  0x78   :  { %2335 = vmatprep.subr.bf16.mxu1 %v5844_v41  ;;  %v5922_v40 = vld [vmem:[#allocation5 + $0x704] ss:$28 sps:$4 sm:$0xff]   ;;  %v110_v41 = vld [vmem:[#allocation2 + $0x28] sm:$0xff] }
  0x7a   :  { %2293 = vmatpush2.bf16.msra.mxu0 %v5846_v42  ;;  %v116_v42 = vld [vmem:[#allocation2 + $0x58] sm:$0xff] }
  0x7b   :  { %2336 = vmatpush2.bf16.msra.mxu1 %v5847_v43  ;;  %2294 = vmatprep.subr.bf16.mxu0 %v5848_v44  ;;  %v5925_v43 = vld [vmem:[#allocation5 + $0xc] ss:$28 sps:$4 sm:$0xff]   ;;  %v6879_v44 = vpack.c.bf16 %v116_v42, %v110_v41  ;;  %v6006_v42 = vld [vmem:[#allocation5 + $0x3fc] ss:$28 sps:$4 sm:$0xff]  }
  0x7c   :  { %2337 = vmatprep.subr.bf16.mxu1 %v5850_v45  ;;  %v5920_v45 = vld [vmem:[#allocation5 + $0x700] ss:$28 sps:$4 sm:$0xff]   ;;  %v6001_v41 = vld [vmem:[#allocation5 + $0x7b0] ss:$28 sps:$4 sm:$0xff]  }
  0x7e   :  { %2295 = vmatpush2.bf16.msra.mxu0 %v5852_v47  ;;  %v5928_v47 = vld [vmem:[#allocation5 + $0xa4c] ss:$28 sps:$4 sm:$0xff]  }
  0x7f   :  { %2338 = vmatpush2.bf16.msra.mxu1 %v5853_v48  ;;  %2296 = vmatprep.subr.bf16.mxu0 %v5854_v53  ;;  %v5931_v48 = vld [vmem:[#allocation5 + $0x354] ss:$28 sps:$4 sm:$0xff]   ;;  %v5937_v53 = vld [vmem:[#allocation5 + $0x31c] ss:$28 sps:$4 sm:$0xff]  }
  0x80   :  { %2339 = vmatprep.subr.bf16.mxu1 %v5856_v54  ;;  %v5932_v54 = vld [vmem:[#allocation5 + $0xa10] ss:$28 sps:$4 sm:$0xff]  }
  0x82   :  { %2297 = vmatpush2.bf16.msra.mxu0 %v5858_v56  ;;  %v5935_v56 = vld [vmem:[#allocation5 + $0x318] ss:$28 sps:$4 sm:$0xff]  }
  0x83   :  { %2340 = vmatpush2.bf16.msra.mxu1 %v5859_v57  ;;  %2298 = vmatprep.subr.bf16.mxu0 %v5860_v58  ;;  %v5940_v57 = vld [vmem:[#allocation5 + $0x9dc] ss:$28 sps:$4 sm:$0xff]   ;;  %v5943_v58 = vld [vmem:[#allocation5 + $0x2e4] ss:$28 sps:$4 sm:$0xff]  }
  0x84   :  { %2341 = vmatprep.subr.bf16.mxu1 %v5862_v59  ;;  %v5938_v59 = vld [vmem:[#allocation5 + $0x9d8] ss:$28 sps:$4 sm:$0xff]  }
  0x86   :  { %2299 = vmatpush2.bf16.msra.mxu0 %v5864_v60  ;;  %v5941_v60 = vld [vmem:[#allocation5 + $0x2e0] ss:$28 sps:$4 sm:$0xff]  }
  0x87   :  { %2342 = vmatpush2.bf16.msra.mxu1 %v5865_v61  ;;  %2300 = vmatprep.subr.bf16.mxu0 %v5866_v62  ;;  %v5946_v61 = vld [vmem:[#allocation5 + $0x9a4] ss:$28 sps:$4 sm:$0xff]   ;;  %v5949_v62 = vld [vmem:[#allocation5 + $0x2ac] ss:$28 sps:$4 sm:$0xff]  }
  0x88   :  { %2343 = vmatprep.subr.bf16.mxu1 %v5868_v63  ;;  %v5944_v63 = vld [vmem:[#allocation5 + $0x9a0] ss:$28 sps:$4 sm:$0xff]  }
  0x8a   :  { %2301 = vmatpush2.bf16.msra.mxu0 %v5870_v0  ;;  %v5947_v0 = vld [vmem:[#allocation5 + $0x2a8] ss:$28 sps:$4 sm:$0xff]  }
  0x8b   :  { %2344 = vmatpush2.bf16.msra.mxu1 %v5871_v1  ;;  %2302 = vmatprep.subr.bf16.mxu0 %v5872_v2  ;;  %v5952_v1 = vld [vmem:[#allocation5 + $0x96c] ss:$28 sps:$4 sm:$0xff]   ;;  %v5955_v2 = vld [vmem:[#allocation5 + $0x274] ss:$28 sps:$4 sm:$0xff]  }
  0x8c   :  { %2345 = vmatprep.subr.bf16.mxu1 %v5874_v3  ;;  %v5950_v3 = vld [vmem:[#allocation5 + $0x968] ss:$28 sps:$4 sm:$0xff]  }
  0x8e   :  { %2303 = vmatpush2.bf16.msra.mxu0 %v5876_v4  ;;  %v5953_v4 = vld [vmem:[#allocation5 + $0x270] ss:$28 sps:$4 sm:$0xff]  }
  0x8f   :  { %2346 = vmatpush2.bf16.msra.mxu1 %v5877_v5  ;;  %2358 = vmatprep.subr.bf16.mxu0 %v5880_v8  ;;  %v5958_v5 = vld [vmem:[#allocation5 + $0x934] ss:$28 sps:$4 sm:$0xff]  }
  0x90   :  { %2401 = vmatprep.subr.bf16.mxu1 %v5883_v11  ;;  %v5959_v8 = vld [vmem:[#allocation5 + $0x238] ss:$28 sps:$4 sm:$0xff]  }
  0x91   :  { %2305 = vmatmul.mubr.bf16.vlgmr.msra.gmra.mxu0 %v6872_v12  ;;  %v5962_v11 = vld [vmem:[#allocation5 + $0x8f8] ss:$28 sps:$4 sm:$0xff]  }
  0x92   :  { %2348 = vmatmul.mubr.bf16.vlgmr.msra.gmra.mxu1 %v6874_v15  ;;  %2359 = vmatpush1.bf16.msra.mxu0 %v5878_v13  ;;  %v5965_v13 = vld [vmem:[#allocation5 + $0x200] ss:$28 sps:$4 sm:$0xff]  }
  0x93   :  { %2402 = vmatpush1.bf16.msra.mxu1 %v5881_v14  ;;  %2360 = vmatprep.subr.bf16.mxu0 %v5886_v16  ;;  %v5970_v14 = vld [vmem:[#allocation5 + $0x8c4] ss:$28 sps:$4 sm:$0xff]   ;;  %v5973_v16 = vld [vmem:[#allocation5 + $0x1cc] ss:$28 sps:$4 sm:$0xff]  }
  0x94   :  { %2403 = vmatprep.subr.bf16.mxu1 %v5889_v17  ;;  %2433 = vmatprep.mubr.bf16.mxu1 %v6866_v50  ;;  %v5968_v17 = vld [vmem:[#allocation5 + $0x8c0] ss:$28 sps:$4 sm:$0xff]  }
  0x95   :  { %2390 = vmatprep.mubr.bf16.mxu0 %v6879_v44 }
  0x96   :  { %2361 = vmatpush1.bf16.msra.mxu0 %v5884_v18  ;;  %v5971_v18 = vld [vmem:[#allocation5 + $0x1c8] ss:$28 sps:$4 sm:$0xff]  }
  0x97   :  { %2404 = vmatpush1.bf16.msra.mxu1 %v5887_v19  ;;  %2362 = vmatprep.subr.bf16.mxu0 %v5892_v20  ;;  %v109_v19 = vld [vmem:[#allocation2 + $0x20] sm:$0xff]  ;;  %v115_v20 = vld [vmem:[#allocation2 + $0x50] sm:$0xff] }
  0x98   :  { %2405 = vmatprep.subr.bf16.mxu1 %v5895_v21  ;;  %v5976_v21 = vld [vmem:[#allocation5 + $0x514] ss:$28 sps:$4 sm:$0xff]  }
  0x9a   :  { %2363 = vmatpush1.bf16.msra.mxu0 %v5890_v22  ;;  %v5979_v22 = vld [vmem:[#allocation5 + $0x894] ss:$28 sps:$4 sm:$0xff]  }
  0x9b   :  { %2406 = vmatpush1.bf16.msra.mxu1 %v5893_v23  ;;  %2364 = vmatprep.subr.bf16.mxu0 %v5898_v24  ;;  %v6882_v23 = vpack.c.bf16 %v115_v20, %v109_v19  ;;  %v5974_v24 = vld [vmem:[#allocation5 + $0x510] ss:$28 sps:$4 sm:$0xff]   ;;  %v6060_v19 = vld [vmem:[#allocation5 + $0x584] ss:$28 sps:$4 sm:$0xff]  }
  0x9c   :  { %2407 = vmatprep.subr.bf16.mxu1 %v5901_v25  ;;  %v5977_v25 = vld [vmem:[#allocation5 + $0x890] ss:$28 sps:$4 sm:$0xff]   ;;  %v6063_v20 = vld [vmem:[#allocation5 + $0x904] ss:$28 sps:$4 sm:$0xff]  }
  0x9e   :  { %2365 = vmatpush1.bf16.msra.mxu0 %v5896_v26  ;;  %v5982_v26 = vld [vmem:[#allocation5 + $0x4dc] ss:$28 sps:$4 sm:$0xff]  }
  0x9f   :  { %2408 = vmatpush1.bf16.msra.mxu1 %v5899_v27  ;;  %2366 = vmatprep.subr.bf16.mxu0 %v5904_v28  ;;  %v5985_v27 = vld [vmem:[#allocation5 + $0x85c] ss:$28 sps:$4 sm:$0xff]  }
  0xa0   :  { %2409 = vmatprep.subr.bf16.mxu1 %v5907_v29  ;;  %v5980_v28 = vld [vmem:[#allocation5 + $0x4d8] ss:$28 sps:$4 sm:$0xff]  }
  0xa1   :  { %v5983_v29 = vld [vmem:[#allocation5 + $0x858] ss:$28 sps:$4 sm:$0xff]  }
  0xa2   :  { %2367 = vmatpush1.bf16.msra.mxu0 %v5902_v30  ;;  %v5988_v30 = vld [vmem:[#allocation5 + $0x4a4] ss:$28 sps:$4 sm:$0xff]  }
  0xa3   :  { %2410 = vmatpush1.bf16.msra.mxu1 %v5905_v31  ;;  %2368 = vmatprep.subr.bf16.mxu0 %v5910_v32  ;;  %v5991_v31 = vld [vmem:[#allocation5 + $0x824] ss:$28 sps:$4 sm:$0xff]  }
  0xa4   :  { %2411 = vmatprep.subr.bf16.mxu1 %v5913_v33  ;;  %v5986_v32 = vld [vmem:[#allocation5 + $0x4a0] ss:$28 sps:$4 sm:$0xff]  }
  0xa5   :  { %v5989_v33 = vld [vmem:[#allocation5 + $0x820] ss:$28 sps:$4 sm:$0xff]  }
  0xa6   :  { %2369 = vmatpush1.bf16.msra.mxu0 %v5908_v34  ;;  %v5994_v34 = vld [vmem:[#allocation5 + $0x46c] ss:$28 sps:$4 sm:$0xff]  }
  0xa7   :  { %2412 = vmatpush1.bf16.msra.mxu1 %v5911_v35  ;;  %2370 = vmatprep.subr.bf16.mxu0 %v5916_v36  ;;  %v5997_v35 = vld [vmem:[#allocation5 + $0x7ec] ss:$28 sps:$4 sm:$0xff]  }
  0xa8   :  { %2413 = vmatprep.subr.bf16.mxu1 %v5919_v37  ;;  %v5992_v36 = vld [vmem:[#allocation5 + $0x468] ss:$28 sps:$4 sm:$0xff]  }
  0xa9   :  { %v5995_v37 = vld [vmem:[#allocation5 + $0x7e8] ss:$28 sps:$4 sm:$0xff]  }
  0xaa   :  { %2371 = vmatpush1.bf16.msra.mxu0 %v5914_v38  ;;  %v6000_v38 = vld [vmem:[#allocation5 + $0x434] ss:$28 sps:$4 sm:$0xff]  }
  0xab   :  { %2414 = vmatpush1.bf16.msra.mxu1 %v5917_v39  ;;  %2372 = vmatprep.subr.bf16.mxu0 %v5922_v40  ;;  %v6003_v39 = vld [vmem:[#allocation5 + $0x7b4] ss:$28 sps:$4 sm:$0xff]  }
  0xac   :  { %2415 = vmatprep.subr.bf16.mxu1 %v5925_v43  ;;  %v5998_v40 = vld [vmem:[#allocation5 + $0x430] ss:$28 sps:$4 sm:$0xff]   ;;  %v6009_v43 = vld [vmem:[#allocation5 + $0x77c] ss:$28 sps:$4 sm:$0xff]  }
  0xae   :  { %2373 = vmatpush1.bf16.msra.mxu0 %v5920_v45  ;;  %v6004_v45 = vld [vmem:[#allocation5 + $0x3f8] ss:$28 sps:$4 sm:$0xff]  }
  0xaf   :  { %2416 = vmatpush1.bf16.msra.mxu1 %v5923_v46  ;;  %2374 = vmatprep.subr.bf16.mxu0 %v5928_v47  ;;  %v6007_v46 = vld [vmem:[#allocation5 + $0x778] ss:$28 sps:$4 sm:$0xff]   ;;  %v6012_v47 = vld [vmem:[#allocation5 + $0x3c4] ss:$28 sps:$4 sm:$0xff]  }
  0xb0   :  { %2417 = vmatprep.subr.bf16.mxu1 %v5931_v48  ;;  %v6015_v48 = vld [vmem:[#allocation5 + $0x744] ss:$28 sps:$4 sm:$0xff]  }
  0xb2   :  { %2375 = vmatpush2.bf16.msra.mxu0 %v5926_v49  ;;  %v6010_v49 = vld [vmem:[#allocation5 + $0x3c0] ss:$28 sps:$4 sm:$0xff]  }
  0xb3   :  { %2418 = vmatpush2.bf16.msra.mxu1 %v5929_v51  ;;  %2376 = vmatprep.subr.bf16.mxu0 %v5934_v52  ;;  %v6013_v51 = vld [vmem:[#allocation5 + $0x740] ss:$28 sps:$4 sm:$0xff]   ;;  %v6018_v52 = vld [vmem:[#allocation5 + $0x38c] ss:$28 sps:$4 sm:$0xff]  }
  0xb4   :  { %2419 = vmatprep.subr.bf16.mxu1 %v5937_v53  ;;  %v6021_v53 = vld [vmem:[#allocation5 + $0x70c] ss:$28 sps:$4 sm:$0xff]  }
  0xb6   :  { %2377 = vmatpush2.bf16.msra.mxu0 %v5932_v54  ;;  %v6016_v54 = vld [vmem:[#allocation5 + $0x388] ss:$28 sps:$4 sm:$0xff]  }
  0xb7   :  { %2420 = vmatpush2.bf16.msra.mxu1 %v5935_v56  ;;  %2378 = vmatprep.subr.bf16.mxu0 %v5940_v57  ;;  %v6019_v56 = vld [vmem:[#allocation5 + $0x708] ss:$28 sps:$4 sm:$0xff]   ;;  %v6024_v57 = vld [vmem:[#allocation5 + $0x6d4] ss:$28 sps:$4 sm:$0xff]  }
  0xb8   :  { %2421 = vmatprep.subr.bf16.mxu1 %v5943_v58  ;;  %v6027_v58 = vld [vmem:[#allocation5 + $0xa54] ss:$28 sps:$4 sm:$0xff]  }
  0xba   :  { %2379 = vmatpush2.bf16.msra.mxu0 %v5938_v59  ;;  %v6022_v59 = vld [vmem:[#allocation5 + $0x6d0] ss:$28 sps:$4 sm:$0xff]  }
  0xbb   :  { %2422 = vmatpush2.bf16.msra.mxu1 %v5941_v60  ;;  %2380 = vmatprep.subr.bf16.mxu0 %v5946_v61  ;;  %v6025_v60 = vld [vmem:[#allocation5 + $0xa50] ss:$28 sps:$4 sm:$0xff]   ;;  %v6030_v61 = vld [vmem:[#allocation5 + $0x69c] ss:$28 sps:$4 sm:$0xff]  }
  0xbc   :  { %2423 = vmatprep.subr.bf16.mxu1 %v5949_v62  ;;  %v6033_v62 = vld [vmem:[#allocation5 + $0xa1c] ss:$28 sps:$4 sm:$0xff]  }
  0xbe   :  { %2381 = vmatpush2.bf16.msra.mxu0 %v5944_v63  ;;  %v6028_v63 = vld [vmem:[#allocation5 + $0x698] ss:$28 sps:$4 sm:$0xff]  }
  0xbf   :  { %2424 = vmatpush2.bf16.msra.mxu1 %v5947_v0  ;;  %2382 = vmatprep.subr.bf16.mxu0 %v5952_v1  ;;  %v6031_v0 = vld [vmem:[#allocation5 + $0xa18] ss:$28 sps:$4 sm:$0xff]   ;;  %v6036_v1 = vld [vmem:[#allocation5 + $0x664] ss:$28 sps:$4 sm:$0xff]  }
  0xc0   :  { %2425 = vmatprep.subr.bf16.mxu1 %v5955_v2  ;;  %v6039_v2 = vld [vmem:[#allocation5 + $0x9e4] ss:$28 sps:$4 sm:$0xff]  }
  0xc2   :  { %2383 = vmatpush2.bf16.msra.mxu0 %v5950_v3  ;;  %v6034_v3 = vld [vmem:[#allocation5 + $0x660] ss:$28 sps:$4 sm:$0xff]  }
  0xc3   :  { %2426 = vmatpush2.bf16.msra.mxu1 %v5953_v4  ;;  %2384 = vmatprep.subr.bf16.mxu0 %v5958_v5  ;;  %v6037_v4 = vld [vmem:[#allocation5 + $0x9e0] ss:$28 sps:$4 sm:$0xff]   ;;  %v6042_v5 = vld [vmem:[#allocation5 + $0x62c] ss:$28 sps:$4 sm:$0xff]  }
  0xc4   :  { %2427 = vmatprep.subr.bf16.mxu1 %v5961_v6  ;;  %v6045_v6 = vld [vmem:[#allocation5 + $0x9ac] ss:$28 sps:$4 sm:$0xff]  }
  0xc6   :  { %2385 = vmatpush2.bf16.msra.mxu0 %v5956_v7  ;;  %v6040_v7 = vld [vmem:[#allocation5 + $0x628] ss:$28 sps:$4 sm:$0xff]  }
  0xc7   :  { %2428 = vmatpush2.bf16.msra.mxu1 %v5959_v8  ;;  %2386 = vmatprep.subr.bf16.mxu0 %v5964_v9  ;;  %v6043_v8 = vld [vmem:[#allocation5 + $0x9a8] ss:$28 sps:$4 sm:$0xff]   ;;  %v6048_v9 = vld [vmem:[#allocation5 + $0x5f4] ss:$28 sps:$4 sm:$0xff]  }
  0xc8   :  { %2429 = vmatprep.subr.bf16.mxu1 %v5967_v10  ;;  %v6051_v10 = vld [vmem:[#allocation5 + $0x974] ss:$28 sps:$4 sm:$0xff]  }
  0xca   :  { %2387 = vmatpush2.bf16.msra.mxu0 %v5962_v11  ;;  %v6046_v11 = vld [vmem:[#allocation5 + $0x5f0] ss:$28 sps:$4 sm:$0xff]  }
  0xcb   :  { %2430 = vmatpush2.bf16.msra.mxu1 %v5965_v13  ;;  %2388 = vmatprep.subr.bf16.mxu0 %v5970_v14  ;;  %v6049_v13 = vld [vmem:[#allocation5 + $0x970] ss:$28 sps:$4 sm:$0xff]   ;;  %v6054_v14 = vld [vmem:[#allocation5 + $0x5bc] ss:$28 sps:$4 sm:$0xff]  }
  0xcc   :  { %2431 = vmatprep.subr.bf16.mxu1 %v5973_v16  ;;  %v6057_v16 = vld [vmem:[#allocation5 + $0x93c] ss:$28 sps:$4 sm:$0xff]  }
  0xce   :  { %2389 = vmatpush2.bf16.msra.mxu0 %v5968_v17  ;;  %v6052_v17 = vld [vmem:[#allocation5 + $0x5b8] ss:$28 sps:$4 sm:$0xff]  }
  0xcf   :  { %2432 = vmatpush2.bf16.msra.mxu1 %v5971_v18  ;;  %2444 = vmatprep.subr.bf16.mxu0 %v5976_v21  ;;  %v6055_v18 = vld [vmem:[#allocation5 + $0x938] ss:$28 sps:$4 sm:$0xff]   ;;  %v6058_v21 = vld [vmem:[#allocation5 + $0x580] ss:$28 sps:$4 sm:$0xff]  }
  0xd0   :  { %2487 = vmatprep.subr.bf16.mxu1 %v5979_v22  ;;  %v6061_v22 = vld [vmem:[#allocation5 + $0x900] ss:$28 sps:$4 sm:$0xff]  }
  0xd1   :  { %2391 = vmatmul.mubr.bf16.vlgmr.msra.gmra.mxu0 %v6882_v23 }
  0xd2   :  { %2434 = vmatmul.mubr.bf16.vlgmr.msra.gmra.mxu1 %v6872_v12  ;;  %2445 = vmatpush1.bf16.msra.mxu0 %v5974_v24  ;;  %v6066_v24 = vld [vmem:[#allocation5 + $0x54c] ss:$28 sps:$4 sm:$0xff]  }
  0xd3   :  { %2488 = vmatpush1.bf16.msra.mxu1 %v5977_v25  ;;  %2446 = vmatprep.subr.bf16.mxu0 %v5982_v26  ;;  %v6069_v25 = vld [vmem:[#allocation5 + $0x8cc] ss:$28 sps:$4 sm:$0xff]  }
  0xd4   :  { %2489 = vmatprep.subr.bf16.mxu1 %v5985_v27  ;;  %2476 = vmatprep.mubr.bf16.mxu0 %v6868_v55  ;;  %v6064_v26 = vld [vmem:[#allocation5 + $0x548] ss:$28 sps:$4 sm:$0xff]  }
  0xd5   :  { %2519 = vmatprep.mubr.bf16.mxu1 %v6879_v44  ;;  %v6067_v27 = vld [vmem:[#allocation5 + $0x8c8] ss:$28 sps:$4 sm:$0xff]  }
  0xd6   :  { %2447 = vmatpush1.bf16.msra.mxu0 %v5980_v28  ;;  %v6072_v28 = vld [vmem:[#allocation5 + $0x19c] ss:$28 sps:$4 sm:$0xff]  }
  0xd7   :  { %2490 = vmatpush1.bf16.msra.mxu1 %v5983_v29  ;;  %2448 = vmatprep.subr.bf16.mxu0 %v5988_v30  ;;  %v6075_v29 = vld [vmem:[#allocation5 + $0x51c] ss:$28 sps:$4 sm:$0xff]  }
  0xd8   :  { %2491 = vmatprep.subr.bf16.mxu1 %v5991_v31  ;;  %v6070_v30 = vld [vmem:[#allocation5 + $0x198] ss:$28 sps:$4 sm:$0xff]  }
  0xd9   :  { %v6073_v31 = vld [vmem:[#allocation5 + $0x518] ss:$28 sps:$4 sm:$0xff]  }
  0xda   :  { %2449 = vmatpush1.bf16.msra.mxu0 %v5986_v32  ;;  %v6078_v32 = vld [vmem:[#allocation5 + $0x164] ss:$28 sps:$4 sm:$0xff]  }
  0xdb   :  { %2492 = vmatpush1.bf16.msra.mxu1 %v5989_v33  ;;  %2450 = vmatprep.subr.bf16.mxu0 %v5994_v34  ;;  %v6081_v33 = vld [vmem:[#allocation5 + $0x4e4] ss:$28 sps:$4 sm:$0xff]  }
  0xdc   :  { %2493 = vmatprep.subr.bf16.mxu1 %v5997_v35  ;;  %v6076_v34 = vld [vmem:[#allocation5 + $0x160] ss:$28 sps:$4 sm:$0xff]  }
  0xdd   :  { %v6079_v35 = vld [vmem:[#allocation5 + $0x4e0] ss:$28 sps:$4 sm:$0xff]  }
  0xde   :  { %2451 = vmatpush1.bf16.msra.mxu0 %v5992_v36  ;;  %v6084_v36 = vld [vmem:[#allocation5 + $0x12c] ss:$28 sps:$4 sm:$0xff]  }
  0xdf   :  { %2494 = vmatpush1.bf16.msra.mxu1 %v5995_v37  ;;  %2452 = vmatprep.subr.bf16.mxu0 %v6000_v38  ;;  %v6087_v37 = vld [vmem:[#allocation5 + $0x4ac] ss:$28 sps:$4 sm:$0xff]  }
  0xe0   :  { %2495 = vmatprep.subr.bf16.mxu1 %v6003_v39  ;;  %v6082_v38 = vld [vmem:[#allocation5 + $0x128] ss:$28 sps:$4 sm:$0xff]  }
  0xe1   :  { %v6085_v39 = vld [vmem:[#allocation5 + $0x4a8] ss:$28 sps:$4 sm:$0xff]  }
  0xe2   :  { %2453 = vmatpush1.bf16.msra.mxu0 %v5998_v40  ;;  %v6090_v40 = vld [vmem:[#allocation5 + $0xf4] ss:$28 sps:$4 sm:$0xff]  }
  0xe3   :  { %2496 = vmatpush1.bf16.msra.mxu1 %v6001_v41  ;;  %2454 = vmatprep.subr.bf16.mxu0 %v6006_v42  ;;  %v6093_v41 = vld [vmem:[#allocation5 + $0x474] ss:$28 sps:$4 sm:$0xff]  }
  0xe4   :  { %2497 = vmatprep.subr.bf16.mxu1 %v6009_v43  ;;  %v6088_v42 = vld [vmem:[#allocation5 + $0xf0] ss:$28 sps:$4 sm:$0xff]  }
  0xe5   :  { %v6091_v43 = vld [vmem:[#allocation5 + $0x470] ss:$28 sps:$4 sm:$0xff]  }
  0xe6   :  { %2455 = vmatpush1.bf16.msra.mxu0 %v6004_v45  ;;  %v6096_v45 = vld [vmem:[#allocation5 + $0xbc] ss:$28 sps:$4 sm:$0xff]  }
  0xe7   :  { %2498 = vmatpush1.bf16.msra.mxu1 %v6007_v46  ;;  %2456 = vmatprep.subr.bf16.mxu0 %v6012_v47  ;;  %v6099_v46 = vld [vmem:[#allocation5 + $0x43c] ss:$28 sps:$4 sm:$0xff]  }
  0xe8   :  { %2499 = vmatprep.subr.bf16.mxu1 %v6015_v48  ;;  %v6094_v47 = vld [vmem:[#allocation5 + $0xb8] ss:$28 sps:$4 sm:$0xff]  }
  0xe9   :  { %v6097_v48 = vld [vmem:[#allocation5 + $0x438] ss:$28 sps:$4 sm:$0xff]  }
  0xea   :  { %2457 = vmatpush1.bf16.msra.mxu0 %v6010_v49  ;;  %v6102_v49 = vld [vmem:[#allocation5 + $0x84] ss:$28 sps:$4 sm:$0xff]  }
  0xeb   :  { %2500 = vmatpush1.bf16.msra.mxu1 %v6013_v51  ;;  %2458 = vmatprep.subr.bf16.mxu0 %v6018_v52  ;;  %v6105_v51 = vld [vmem:[#allocation5 + $0x404] ss:$28 sps:$4 sm:$0xff]  }
  0xec   :  { %2501 = vmatprep.subr.bf16.mxu1 %v6021_v53  ;;  %v6100_v52 = vld [vmem:[#allocation5 + $0x80] ss:$28 sps:$4 sm:$0xff]  }
  0xed   :  { %v6103_v53 = vld [vmem:[#allocation5 + $0x400] ss:$28 sps:$4 sm:$0xff]  }
  0xee   :  { %2459 = vmatpush1.bf16.msra.mxu0 %v6016_v54  ;;  %v6108_v54 = vld [vmem:[#allocation5 + $0x4c] ss:$28 sps:$4 sm:$0xff]  }
  0xef   :  { %2502 = vmatpush1.bf16.msra.mxu1 %v6019_v56  ;;  %2460 = vmatprep.subr.bf16.mxu0 %v6024_v57  ;;  %v6111_v56 = vld [vmem:[#allocation5 + $0x3cc] ss:$28 sps:$4 sm:$0xff]  }
  0xf0   :  { %2503 = vmatprep.subr.bf16.mxu1 %v6027_v58  ;;  %v6106_v57 = vld [vmem:[#allocation5 + $0x48] ss:$28 sps:$4 sm:$0xff]  }
  0xf1   :  { %v6109_v58 = vld [vmem:[#allocation5 + $0x3c8] ss:$28 sps:$4 sm:$0xff]  }
  0xf2   :  { %2461 = vmatpush2.bf16.msra.mxu0 %v6022_v59  ;;  %v6114_v59 = vld [vmem:[#allocation5 + $0x14] ss:$28 sps:$4 sm:$0xff]  }
  0xf3   :  { %2504 = vmatpush2.bf16.msra.mxu1 %v6025_v60  ;;  %2462 = vmatprep.subr.bf16.mxu0 %v6030_v61  ;;  %v6117_v60 = vld [vmem:[#allocation5 + $0x394] ss:$28 sps:$4 sm:$0xff]  }
  0xf4   :  { %2505 = vmatprep.subr.bf16.mxu1 %v6033_v62  ;;  %v6112_v61 = vld [vmem:[#allocation5 + $0x10] ss:$28 sps:$4 sm:$0xff]  }
  0xf5   :  { %v6115_v62 = vld [vmem:[#allocation5 + $0x390] ss:$28 sps:$4 sm:$0xff]  }
  0xf6   :  { %2463 = vmatpush2.bf16.msra.mxu0 %v6028_v63  ;;  %v6120_v63 = vld [vmem:[#allocation5 + $0x35c] ss:$28 sps:$4 sm:$0xff]  }
  0xf7   :  { %2506 = vmatpush2.bf16.msra.mxu1 %v6031_v0  ;;  %2464 = vmatprep.subr.bf16.mxu0 %v6036_v1  ;;  %v6123_v0 = vld [vmem:[#allocation5 + $0x6dc] ss:$28 sps:$4 sm:$0xff]  }
  0xf8   :  { %2507 = vmatprep.subr.bf16.mxu1 %v6039_v2  ;;  %v6118_v1 = vld [vmem:[#allocation5 + $0x358] ss:$28 sps:$4 sm:$0xff]  }
  0xf9   :  { %v6121_v2 = vld [vmem:[#allocation5 + $0x6d8] ss:$28 sps:$4 sm:$0xff]  }
  0xfa   :  { %2465 = vmatpush2.bf16.msra.mxu0 %v6034_v3  ;;  %v6126_v3 = vld [vmem:[#allocation5 + $0x324] ss:$28 sps:$4 sm:$0xff]  }
  0xfb   :  { %2508 = vmatpush2.bf16.msra.mxu1 %v6037_v4  ;;  %2466 = vmatprep.subr.bf16.mxu0 %v6042_v5  ;;  %v6129_v4 = vld [vmem:[#allocation5 + $0x6a4] ss:$28 sps:$4 sm:$0xff]  }
  0xfc   :  { %2509 = vmatprep.subr.bf16.mxu1 %v6045_v6  ;;  %v6124_v5 = vld [vmem:[#allocation5 + $0x320] ss:$28 sps:$4 sm:$0xff]  }
  0xfd   :  { %v6127_v6 = vld [vmem:[#allocation5 + $0x6a0] ss:$28 sps:$4 sm:$0xff]  }
  0xfe   :  { %2467 = vmatpush2.bf16.msra.mxu0 %v6040_v7  ;;  %v6132_v7 = vld [vmem:[#allocation5 + $0x2ec] ss:$28 sps:$4 sm:$0xff]  }
  0xff   :  { %2510 = vmatpush2.bf16.msra.mxu1 %v6043_v8  ;;  %2468 = vmatprep.subr.bf16.mxu0 %v6048_v9  ;;  %v6135_v8 = vld [vmem:[#allocation5 + $0x66c] ss:$28 sps:$4 sm:$0xff]  }
 0x100   :  { %2511 = vmatprep.subr.bf16.mxu1 %v6051_v10  ;;  %v6130_v9 = vld [vmem:[#allocation5 + $0x2e8] ss:$28 sps:$4 sm:$0xff]  }
 0x101   :  { %v6133_v10 = vld [vmem:[#allocation5 + $0x668] ss:$28 sps:$4 sm:$0xff]  }
 0x102   :  { %2469 = vmatpush2.bf16.msra.mxu0 %v6046_v11  ;;  %v6138_v11 = vld [vmem:[#allocation5 + $0x2b4] ss:$28 sps:$4 sm:$0xff]  }
 0x103   :  { %2512 = vmatpush2.bf16.msra.mxu1 %v6049_v13  ;;  %2470 = vmatprep.subr.bf16.mxu0 %v6054_v14  ;;  %v6141_v13 = vld [vmem:[#allocation5 + $0x634] ss:$28 sps:$4 sm:$0xff]  }
 0x104   :  { %2513 = vmatprep.subr.bf16.mxu1 %v6057_v16  ;;  %v6136_v14 = vld [vmem:[#allocation5 + $0x2b0] ss:$28 sps:$4 sm:$0xff]  }
 0x105   :  { %v6139_v16 = vld [vmem:[#allocation5 + $0x630] ss:$28 sps:$4 sm:$0xff]  }
 0x106   :  { %2471 = vmatpush2.bf16.msra.mxu0 %v6052_v17  ;;  %v6144_v17 = vld [vmem:[#allocation5 + $0x27c] ss:$28 sps:$4 sm:$0xff]  }
 0x107   :  { %2514 = vmatpush2.bf16.msra.mxu1 %v6055_v18  ;;  %2472 = vmatprep.subr.bf16.mxu0 %v6060_v19  ;;  %v6147_v18 = vld [vmem:[#allocation5 + $0x5fc] ss:$28 sps:$4 sm:$0xff]  }
 0x108   :  { %2515 = vmatprep.subr.bf16.mxu1 %v6063_v20  ;;  %v6142_v19 = vld [vmem:[#allocation5 + $0x278] ss:$28 sps:$4 sm:$0xff]  }
 0x109   :  { %v6145_v20 = vld [vmem:[#allocation5 + $0x5f8] ss:$28 sps:$4 sm:$0xff]  }
 0x10a   :  { %2473 = vmatpush2.bf16.msra.mxu0 %v6058_v21  ;;  %v6150_v21 = vld [vmem:[#allocation5 + $0x244] ss:$28 sps:$4 sm:$0xff]  }
 0x10b   :  { %2516 = vmatpush2.bf16.msra.mxu1 %v6061_v22  ;;  %2474 = vmatprep.subr.bf16.mxu0 %v6066_v24  ;;  %v6153_v22 = vld [vmem:[#allocation5 + $0x5c4] ss:$28 sps:$4 sm:$0xff]  }
 0x10c   :  { %2517 = vmatprep.subr.bf16.mxu1 %v6069_v25  ;;  %v6148_v24 = vld [vmem:[#allocation5 + $0x240] ss:$28 sps:$4 sm:$0xff]  }
 0x10d   :  { %v6151_v25 = vld [vmem:[#allocation5 + $0x5c0] ss:$28 sps:$4 sm:$0xff]  }
 0x10e   :  { %2475 = vmatpush2.bf16.msra.mxu0 %v6064_v26  ;;  %v6156_v26 = vld [vmem:[#allocation5 + $0x20c] ss:$28 sps:$4 sm:$0xff]  }
 0x10f   :  { %2518 = vmatpush2.bf16.msra.mxu1 %v6067_v27  ;;  %2530 = vmatprep.subr.bf16.mxu0 %v6072_v28  ;;  %v6159_v27 = vld [vmem:[#allocation5 + $0x58c] ss:$28 sps:$4 sm:$0xff]  }
 0x110   :  { %2573 = vmatprep.subr.bf16.mxu1 %v6075_v29  ;;  %v6154_v28 = vld [vmem:[#allocation5 + $0x208] ss:$28 sps:$4 sm:$0xff]  }
 0x111   :  { %2477 = vmatmul.mubr.bf16.vlgmr.msra.gmra.mxu0 %v6874_v15  ;;  %v6157_v29 = vld [vmem:[#allocation5 + $0x588] ss:$28 sps:$4 sm:$0xff]  }
 0x112   :  { %2520 = vmatmul.mubr.bf16.vlgmr.msra.gmra.mxu1 %v6882_v23  ;;  %2531 = vmatpush1.bf16.msra.mxu0 %v6070_v30  ;;  %v6162_v30 = vld [vmem:[#allocation5 + $0x1d4] ss:$28 sps:$4 sm:$0xff]  }
 0x113   :  { %2574 = vmatpush1.bf16.msra.mxu1 %v6073_v31  ;;  %2532 = vmatprep.subr.bf16.mxu0 %v6078_v32  ;;  %v6165_v31 = vld [vmem:[#allocation5 + $0x554] ss:$28 sps:$4 sm:$0xff]  }
 0x114   :  { %2575 = vmatprep.subr.bf16.mxu1 %v6081_v33  ;;  %2562 = vmatprep.mubr.bf16.mxu0 %v6866_v50  ;;  %v6160_v32 = vld [vmem:[#allocation5 + $0x1d0] ss:$28 sps:$4 sm:$0xff]  }
 0x115   :  { %2605 = vmatprep.mubr.bf16.mxu1 %v6868_v55  ;;  %v6163_v33 = vld [vmem:[#allocation5 + $0x550] ss:$28 sps:$4 sm:$0xff]  }
 0x116   :  { %2533 = vmatpush1.bf16.msra.mxu0 %v6076_v34  ;;  %v6168_v34 = vld [vmem:[#allocation5 + $0x89c] ss:$28 sps:$4 sm:$0xff]  }
 0x117   :  { %2576 = vmatpush1.bf16.msra.mxu1 %v6079_v35  ;;  %2534 = vmatprep.subr.bf16.mxu0 %v6084_v36  ;;  %v6169_v35 = vld [vmem:[#allocation5 + $0x360] ss:$28 sps:$4 sm:$0xff]   ;;  %v6166_v36 = vld [vmem:[#allocation5 + $0x898] ss:$28 sps:$4 sm:$0xff]  }
 0x118   :  { %2577 = vmatprep.subr.bf16.mxu1 %v6087_v37  ;;  %v6170_v37 = vld [vmem:[#allocation5 + $0x1a0] ss:$28 sps:$4 sm:$0xff]  }
 0x11a   :  { %2535 = vmatpush1.bf16.msra.mxu0 %v6082_v38  ;;  %v6173_v38 = vld [vmem:[#allocation5 + $0x864] ss:$28 sps:$4 sm:$0xff]  }
 0x11b   :  { %2578 = vmatpush1.bf16.msra.mxu1 %v6085_v39  ;;  %2536 = vmatprep.subr.bf16.mxu0 %v6090_v40  ;;  %v6174_v39 = vld [vmem:[#allocation5 + $0x328] ss:$28 sps:$4 sm:$0xff]   ;;  %v6171_v40 = vld [vmem:[#allocation5 + $0x860] ss:$28 sps:$4 sm:$0xff]  }
 0x11c   :  { %2579 = vmatprep.subr.bf16.mxu1 %v6093_v41  ;;  %v6175_v41 = vld [vmem:[#allocation5 + $0x168] ss:$28 sps:$4 sm:$0xff]  }
 0x11e   :  { %2537 = vmatpush1.bf16.msra.mxu0 %v6088_v42  ;;  %v6178_v42 = vld [vmem:[#allocation5 + $0x82c] ss:$28 sps:$4 sm:$0xff]  }
 0x11f   :  { %2580 = vmatpush1.bf16.msra.mxu1 %v6091_v43  ;;  %2538 = vmatprep.subr.bf16.mxu0 %v6096_v45  ;;  %v6179_v43 = vld [vmem:[#allocation5 + $0x2f0] ss:$28 sps:$4 sm:$0xff]   ;;  %v6176_v45 = vld [vmem:[#allocation5 + $0x828] ss:$28 sps:$4 sm:$0xff]  }
 0x120   :  { %2581 = vmatprep.subr.bf16.mxu1 %v6099_v46  ;;  %v6180_v46 = vld [vmem:[#allocation5 + $0x130] ss:$28 sps:$4 sm:$0xff]  }
 0x122   :  { %2539 = vmatpush1.bf16.msra.mxu0 %v6094_v47  ;;  %v6183_v47 = vld [vmem:[#allocation5 + $0x7f4] ss:$28 sps:$4 sm:$0xff]  }
 0x123   :  { %2582 = vmatpush1.bf16.msra.mxu1 %v6097_v48  ;;  %2540 = vmatprep.subr.bf16.mxu0 %v6102_v49  ;;  %v6184_v48 = vld [vmem:[#allocation5 + $0x2b8] ss:$28 sps:$4 sm:$0xff]   ;;  %v6181_v49 = vld [vmem:[#allocation5 + $0x7f0] ss:$28 sps:$4 sm:$0xff]  }
 0x124   :  { %2583 = vmatprep.subr.bf16.mxu1 %v6105_v51  ;;  %v6185_v51 = vld [vmem:[#allocation5 + $0xf8] ss:$28 sps:$4 sm:$0xff]  }
 0x126   :  { %2541 = vmatpush1.bf16.msra.mxu0 %v6100_v52  ;;  %v6188_v52 = vld [vmem:[#allocation5 + $0x7bc] ss:$28 sps:$4 sm:$0xff]  }
 0x127   :  { %2584 = vmatpush1.bf16.msra.mxu1 %v6103_v53  ;;  %2542 = vmatprep.subr.bf16.mxu0 %v6108_v54  ;;  %v6189_v53 = vld [vmem:[#allocation5 + $0x280] ss:$28 sps:$4 sm:$0xff]   ;;  %v6186_v54 = vld [vmem:[#allocation5 + $0x7b8] ss:$28 sps:$4 sm:$0xff]  }
 0x128   :  { %2585 = vmatprep.subr.bf16.mxu1 %v6111_v56  ;;  %v6193_v56 = vld [vmem:[#allocation5 + $0x784] ss:$28 sps:$4 sm:$0xff]  }
 0x12a   :  { %2543 = vmatpush1.bf16.msra.mxu0 %v6106_v57  ;;  %v6194_v57 = vld [vmem:[#allocation5 + $0x248] ss:$28 sps:$4 sm:$0xff]  }
 0x12b   :  { %2586 = vmatpush1.bf16.msra.mxu1 %v6109_v58  ;;  %2544 = vmatprep.subr.bf16.mxu0 %v6114_v59  ;;  %v6191_v58 = vld [vmem:[#allocation5 + $0x780] ss:$28 sps:$4 sm:$0xff]   ;;  %v6195_v59 = vld [vmem:[#allocation5 + $0x88] ss:$28 sps:$4 sm:$0xff]  }
 0x12c   :  { %2587 = vmatprep.subr.bf16.mxu1 %v6117_v60  ;;  %v6198_v60 = vld [vmem:[#allocation5 + $0x74c] ss:$28 sps:$4 sm:$0xff]  }
 0x12e   :  { %2545 = vmatpush1.bf16.msra.mxu0 %v6112_v61  ;;  %v6199_v61 = vld [vmem:[#allocation5 + $0x210] ss:$28 sps:$4 sm:$0xff]  }
 0x12f   :  { %2588 = vmatpush1.bf16.msra.mxu1 %v6115_v62  ;;  %2546 = vmatprep.subr.bf16.mxu0 %v6120_v63  ;;  %v6196_v62 = vld [vmem:[#allocation5 + $0x748] ss:$28 sps:$4 sm:$0xff]   ;;  %v6200_v63 = vld [vmem:[#allocation5 + $0x50] ss:$28 sps:$4 sm:$0xff]  }
 0x130   :  { %2589 = vmatprep.subr.bf16.mxu1 %v6123_v0  ;;  %v6203_v0 = vld [vmem:[#allocation5 + $0x714] ss:$28 sps:$4 sm:$0xff]  }
 0x132   :  { %2547 = vmatpush2.bf16.msra.mxu0 %v6118_v1  ;;  %v6204_v1 = vld [vmem:[#allocation5 + $0x1d8] ss:$28 sps:$4 sm:$0xff]  }
 0x133   :  { %2590 = vmatpush2.bf16.msra.mxu1 %v6121_v2  ;;  %2548 = vmatprep.subr.bf16.mxu0 %v6126_v3  ;;  %v6201_v2 = vld [vmem:[#allocation5 + $0x710] ss:$28 sps:$4 sm:$0xff]   ;;  %v6205_v3 = vld [vmem:[#allocation5 + $0x18] ss:$28 sps:$4 sm:$0xff]  }
 0x134   :  { %2591 = vmatprep.subr.bf16.mxu1 %v6129_v4  ;;  %v6208_v4 = vld [vmem:[#allocation5 + $0xa5c] ss:$28 sps:$4 sm:$0xff]  }
 0x136   :  { %2549 = vmatpush2.bf16.msra.mxu0 %v6124_v5  ;;  %v6209_v5 = vld [vmem:[#allocation5 + $0x6e0] ss:$28 sps:$4 sm:$0xff]  }
 0x137   :  { %2592 = vmatpush2.bf16.msra.mxu1 %v6127_v6  ;;  %2550 = vmatprep.subr.bf16.mxu0 %v6132_v7  ;;  %v6206_v6 = vld [vmem:[#allocation5 + $0xa58] ss:$28 sps:$4 sm:$0xff]   ;;  %v6210_v7 = vld [vmem:[#allocation5 + $0x520] ss:$28 sps:$4 sm:$0xff]  }
 0x138   :  { %2593 = vmatprep.subr.bf16.mxu1 %v6135_v8  ;;  %v6213_v8 = vld [vmem:[#allocation5 + $0xa24] ss:$28 sps:$4 sm:$0xff]  }
 0x13a   :  { %2551 = vmatpush2.bf16.msra.mxu0 %v6130_v9  ;;  %v6214_v9 = vld [vmem:[#allocation5 + $0x6a8] ss:$28 sps:$4 sm:$0xff]  }
 0x13b   :  { %2594 = vmatpush2.bf16.msra.mxu1 %v6133_v10  ;;  %2552 = vmatprep.subr.bf16.mxu0 %v6138_v11  ;;  %v6211_v10 = vld [vmem:[#allocation5 + $0xa20] ss:$28 sps:$4 sm:$0xff]   ;;  %v6215_v11 = vld [vmem:[#allocation5 + $0x4e8] ss:$28 sps:$4 sm:$0xff]  }
 0x13c   :  { %2595 = vmatprep.subr.bf16.mxu1 %v6141_v13  ;;  %v6218_v13 = vld [vmem:[#allocation5 + $0x9ec] ss:$28 sps:$4 sm:$0xff]  }
 0x13e   :  { %2553 = vmatpush2.bf16.msra.mxu0 %v6136_v14  ;;  %v6219_v14 = vld [vmem:[#allocation5 + $0x670] ss:$28 sps:$4 sm:$0xff]  }
 0x13f   :  { %2596 = vmatpush2.bf16.msra.mxu1 %v6139_v16  ;;  %2554 = vmatprep.subr.bf16.mxu0 %v6144_v17  ;;  %v6216_v16 = vld [vmem:[#allocation5 + $0x9e8] ss:$28 sps:$4 sm:$0xff]   ;;  %v6220_v17 = vld [vmem:[#allocation5 + $0x4b0] ss:$28 sps:$4 sm:$0xff]  }
 0x140   :  { %2597 = vmatprep.subr.bf16.mxu1 %v6147_v18  ;;  %v6223_v18 = vld [vmem:[#allocation5 + $0x9b4] ss:$28 sps:$4 sm:$0xff]  }
 0x142   :  { %2555 = vmatpush2.bf16.msra.mxu0 %v6142_v19  ;;  %v6224_v19 = vld [vmem:[#allocation5 + $0x638] ss:$28 sps:$4 sm:$0xff]  }
 0x143   :  { %2598 = vmatpush2.bf16.msra.mxu1 %v6145_v20  ;;  %2556 = vmatprep.subr.bf16.mxu0 %v6150_v21  ;;  %v6221_v20 = vld [vmem:[#allocation5 + $0x9b0] ss:$28 sps:$4 sm:$0xff]   ;;  %v6225_v21 = vld [vmem:[#allocation5 + $0x478] ss:$28 sps:$4 sm:$0xff]  }
 0x144   :  { %2599 = vmatprep.subr.bf16.mxu1 %v6153_v22  ;;  %v6228_v22 = vld [vmem:[#allocation5 + $0x97c] ss:$28 sps:$4 sm:$0xff]  }
 0x146   :  { %2557 = vmatpush2.bf16.msra.mxu0 %v6148_v24  ;;  %v6226_v24 = vld [vmem:[#allocation5 + $0x978] ss:$28 sps:$4 sm:$0xff]  }
 0x147   :  { %2600 = vmatpush2.bf16.msra.mxu1 %v6151_v25  ;;  %2558 = vmatprep.subr.bf16.mxu0 %v6156_v26  ;;  %v6230_v25 = vld [vmem:[#allocation5 + $0x440] ss:$28 sps:$4 sm:$0xff]  }
 0x148   :  { %2601 = vmatprep.subr.bf16.mxu1 %v6159_v27  ;;  %v6233_v26 = vld [vmem:[#allocation5 + $0x944] ss:$28 sps:$4 sm:$0xff]  }
 0x149   :  { %v6234_v27 = vld [vmem:[#allocation5 + $0x5c8] ss:$28 sps:$4 sm:$0xff]  }
 0x14a   :  { %2559 = vmatpush2.bf16.msra.mxu0 %v6154_v28  ;;  %v6231_v28 = vld [vmem:[#allocation5 + $0x940] ss:$28 sps:$4 sm:$0xff]  }
 0x14b   :  { %2602 = vmatpush2.bf16.msra.mxu1 %v6157_v29  ;;  %2560 = vmatprep.subr.bf16.mxu0 %v6162_v30  ;;  %v6235_v29 = vld [vmem:[#allocation5 + $0x408] ss:$28 sps:$4 sm:$0xff]  }
 0x14c   :  { %2603 = vmatprep.subr.bf16.mxu1 %v6165_v31  ;;  %v6238_v30 = vld [vmem:[#allocation5 + $0x90c] ss:$28 sps:$4 sm:$0xff]  }
 0x14d   :  { %v6239_v31 = vld [vmem:[#allocation5 + $0x590] ss:$28 sps:$4 sm:$0xff]  }
 0x14e   :  { %2561 = vmatpush2.bf16.msra.mxu0 %v6160_v32 }
 0x14f   :  { %2604 = vmatpush2.bf16.msra.mxu1 %v6163_v33  ;;  %2616 = vmatprep.subr.bf16.mxu0 %v6168_v34  ;;  %v6236_v34 = vld [vmem:[#allocation5 + $0x908] ss:$28 sps:$4 sm:$0xff]  }
 0x150   :  { %5625 = vmatprep.subr.bf16.mxu1 %v6169_v35  ;;  %v6240_v35 = vld [vmem:[#allocation5 + $0x3d0] ss:$28 sps:$4 sm:$0xff]  }
 0x151   :  { %2563 = vmatmul.mubr.bf16.vlgmr.msra.gmra.mxu0 %v6872_v12  ;;  %v6898_v32 = vpop.f32.mrf.mxu0 }
 0x152   :  { %2606 = vmatmul.mubr.bf16.vlgmr.msra.gmra.mxu1 %v6874_v15  ;;  %2617 = vmatpush1.bf16.msra.mxu0 %v6166_v36  ;;  %v6243_v36 = vld [vmem:[#allocation5 + $0x8d4] ss:$28 sps:$4 sm:$0xff]  }
 0x153   :  { %5626 = vmatpush3.bf16.msra.mxu1 %v6170_v37  ;;  %2618 = vmatprep.subr.bf16.mxu0 %v6173_v38  ;;  %v6244_v37 = vld [vmem:[#allocation5 + $0x558] ss:$28 sps:$4 sm:$0xff]  }
 0x154   :  { %5627 = vmatprep.subr.bf16.mxu1 %v6174_v39  ;;  %2691 = vmatprep.mubr.bf16.mxu1 %v6866_v50  ;;  %v6190_v50 = vld [vmem:[#allocation5 + $0xc0] ss:$28 sps:$4 sm:$0xff]   ;;  %v2308_v39 = vpop.f32.mrf.mxu0 }
 0x155   :  { %2648 = vmatprep.mubr.bf16.mxu0 %v6879_v44  ;;  %v6902_v38 = vld [vmem:[#allocation11] ss:$4 sm:$0xff] }
 0x156   :  { %2619 = vmatpush1.bf16.msra.mxu0 %v6171_v40  ;;  %v6904_v40 = vpop.f32.mrf.mxu1 }
 0x157   :  { %5628 = vmatpush3.bf16.msra.mxu1 %v6175_v41  ;;  %2620 = vmatprep.subr.bf16.mxu0 %v6178_v42  ;;  %v6241_v42 = vld [vmem:[#allocation5 + $0x8d0] ss:$28 sps:$4 sm:$0xff]  }
 0x158   :  { %5629 = vmatprep.subr.bf16.mxu1 %v6179_v43  ;;  %v6245_v43 = vld [vmem:[#allocation5 + $0x398] ss:$28 sps:$4 sm:$0xff]  }
 0x15a   :  { %2621 = vmatpush1.bf16.msra.mxu0 %v6176_v45  ;;  %v6246_v45 = vld [vmem:[#allocation5 + $0xa60] ss:$28 sps:$4 sm:$0xff]  }
 0x15b   :  { %5630 = vmatpush3.bf16.msra.mxu1 %v6180_v46  ;;  %2622 = vmatprep.subr.bf16.mxu0 %v6183_v47  ;;  %v6249_v46 = vld [vmem:[#allocation7 + $0xe4] ss:$16 sps:$4 sm:$0xff]   ;;  %v6907_v47 = vpop.f32.mrf.mxu0 }
 0x15c   :  { %5631 = vmatprep.subr.bf16.mxu1 %v6184_v48  ;;  %v2351_v48 = vpop.f32.mrf.mxu1 }
 0x15e   :  { %2623 = vmatpush1.bf16.msra.mxu0 %v6181_v49 }
 0x15f   :  { %5632 = vmatpush3.bf16.msra.mxu1 %v6185_v51  ;;  %2624 = vmatprep.subr.bf16.mxu0 %v6188_v52  ;;  %v6247_v51 = vld [vmem:[#allocation7 + $0xe0] ss:$16 sps:$4 sm:$0xff]  }
 0x160   :  { %5633 = vmatprep.subr.bf16.mxu1 %v6189_v53  ;;  %v6250_v52 = vld [vmem:[#allocation5 + $0x8a0] ss:$28 sps:$4 sm:$0xff]   ;;  %v6251_v53 = vld [vmem:[#allocation5 + $0xa28] ss:$28 sps:$4 sm:$0xff]  }
 0x162   :  { %2625 = vmatpush1.bf16.msra.mxu0 %v6186_v54  ;;  %v6254_v54 = vld [vmem:[#allocation7 + $0xc4] ss:$16 sps:$4 sm:$0xff]  }
 0x163   :  { %5634 = vmatpush3.bf16.msra.mxu1 %v6190_v50  ;;  %2626 = vmatprep.subr.bf16.mxu0 %v6193_v56  ;;  %v2312_v50 = vpop.f32.mrf.mxu0  ;;  %v6912_v56 = vpop.f32.mrf.mxu1 }
 0x164   :  { %5635 = vmatprep.subr.bf16.mxu1 %v6194_v57 }
 0x166   :  { %2627 = vmatpush1.bf16.msra.mxu0 %v6191_v58  ;;  %v6252_v58 = vld [vmem:[#allocation7 + $0xc0] ss:$16 sps:$4 sm:$0xff]  }
 0x167   :  { %5636 = vmatpush3.bf16.msra.mxu1 %v6195_v59  ;;  %2628 = vmatprep.subr.bf16.mxu0 %v6198_v60  ;;  %v6255_v59 = vld [vmem:[#allocation5 + $0x868] ss:$28 sps:$4 sm:$0xff]  }
 0x168   :  { %5637 = vmatprep.subr.bf16.mxu1 %v6199_v61  ;;  %v6256_v61 = vld [vmem:[#allocation5 + $0x9f0] ss:$28 sps:$4 sm:$0xff]  }
 0x16a   :  { %2629 = vmatpush1.bf16.msra.mxu0 %v6196_v62  ;;  %v6259_v62 = vld [vmem:[#allocation7 + $0xa4] ss:$16 sps:$4 sm:$0xff]  }
 0x16b   :  { %5638 = vmatpush3.bf16.msra.mxu1 %v6200_v63  ;;  %2630 = vmatprep.subr.bf16.mxu0 %v6203_v0  ;;  %v2355_v0 = vpop.f32.mrf.mxu1 }
 0x16c   :  { %5639 = vmatprep.subr.bf16.mxu1 %v6204_v1 }
 0x16e   :  { %2631 = vmatpush1.bf16.msra.mxu0 %v6201_v2 }
 0x16f   :  { %5640 = vmatpush3.bf16.msra.mxu1 %v6205_v3  ;;  %2632 = vmatprep.subr.bf16.mxu0 %v6208_v4  ;;  %v6257_v3 = vld [vmem:[#allocation7 + $0xa0] ss:$16 sps:$4 sm:$0xff]  }
 0x170   :  { %5647 = vmatprep.subr.bf16.mxu1 %v6209_v5  ;;  %v6260_v4 = vld [vmem:[#allocation5 + $0x830] ss:$28 sps:$4 sm:$0xff]  }
 0x172   :  { %2692 = vmatmul.mubr.bf16.vlgmr.msra.gmra.mxu1 %v6872_v12  ;;  %2633 = vmatpush2.bf16.msra.mxu0 %v6206_v6  ;;  %v6229_v12 = vld [vmem:[#allocation5 + $0x600] ss:$28 sps:$4 sm:$0xff]   ;;  %v6261_v6 = vld [vmem:[#allocation5 + $0x9b8] ss:$28 sps:$4 sm:$0xff]  }
 0x173   :  { %5648 = vmatpush3.bf16.msra.mxu1 %v6210_v7  ;;  %2634 = vmatprep.subr.bf16.mxu0 %v6213_v8  ;;  %v6264_v7 = vld [vmem:[#allocation7 + $0x84] ss:$16 sps:$4 sm:$0xff]  }
 0x174   :  { %5649 = vmatprep.subr.bf16.mxu1 %v6214_v9  ;;  %2732 = vmatprep.mubr.bf16.mxu1 %v6868_v55  ;;  %v509_v55 = vlaneseq }
 0x176   :  { %2635 = vmatpush2.bf16.msra.mxu0 %v6211_v10  ;;  %v6900_v33 = vshrl.u32 %v509_v55, 7  ;;  %v6280_v55 = vld [vmem:[#allocation5 + $0x750] ss:$28 sps:$4 sm:$0xff]  }
 0x177   :  { %5650 = vmatpush3.bf16.msra.mxu1 %v6215_v11  ;;  %2636 = vmatprep.subr.bf16.mxu0 %v6218_v13  ;;  %v6262_v11 = vld [vmem:[#allocation7 + $0x80] ss:$16 sps:$4 sm:$0xff]  }
 0x178   :  { %5651 = vmatprep.subr.bf16.mxu1 %v6219_v14  ;;  %v515_v41 = vsub.s32 1, %v6900_v33 }
 0x17a   :  { %2637 = vmatpush2.bf16.msra.mxu0 %v6216_v16  ;;  %v516_v49 = vrot.slane %v6902_v38, %v515_v41  ;;  %v6265_v16 = vld [vmem:[#allocation5 + $0x7f8] ss:$28 sps:$4 sm:$0xff]  }
 0x17b   :  { %5652 = vmatpush3.bf16.msra.mxu1 %v6220_v17  ;;  %2638 = vmatprep.subr.bf16.mxu0 %v6223_v18  ;;  %v6269_v18 = vld [vmem:[#allocation7 + $0x64] ss:$16 sps:$4 sm:$0xff]  }
 0x17c   :  { %5653 = vmatprep.subr.bf16.mxu1 %v6224_v19  ;;  %v2309_v57 = vadd.f32 %v2308_v39, %v516_v49  ;;  %v2313_v63 = vadd.f32 %v2312_v50, %v516_v49  ;;  %v6267_v19 = vld [vmem:[#allocation7 + $0x60] ss:$16 sps:$4 sm:$0xff]   ;;  %v6303_v49 = vld [vmem:[#allocation7 + $0x2a4] ss:$16 sps:$4 sm:$0xff]  }
 0x17d   :  { %v6289_v39 = vld [vmem:[#allocation7 + $0x2e0] ss:$16 sps:$4 sm:$0xff]  }
 0x17e   :  { %2639 = vmatpush2.bf16.msra.mxu0 %v6221_v20  ;;  %v2352_v2 = vadd.f32 %v2351_v48, %v2309_v57  ;;  %v2356_v8 = vadd.f32 %v2355_v0, %v2313_v63  ;;  %v6270_v20 = vld [vmem:[#allocation5 + $0x7c0] ss:$28 sps:$4 sm:$0xff]   ;;  %v6300_v48 = vld [vmem:[#allocation7 + $0x1a4] ss:$16 sps:$4 sm:$0xff]  }
 0x17f   :  { %5654 = vmatpush3.bf16.msra.mxu1 %v6225_v21  ;;  %2640 = vmatprep.subr.bf16.mxu0 %v6228_v22  ;;  %v6271_v21 = vld [vmem:[#allocation5 + $0x948] ss:$28 sps:$4 sm:$0xff]   ;;  %v6304_v50 = vld [vmem:[#allocation7 + $0x180] ss:$16 sps:$4 sm:$0xff]  }
 0x180   :  { %5655 = vmatprep.subr.bf16.mxu1 %v6229_v12  ;;  %v6274_v22 = vld [vmem:[#allocation7 + $0x44] ss:$16 sps:$4 sm:$0xff]   ;;  %v6272_v12 = vld [vmem:[#allocation7 + $0x40] ss:$16 sps:$4 sm:$0xff]  }
 0x181   :  { %v6307_v57 = vld [vmem:[#allocation7 + $0x280] ss:$16 sps:$4 sm:$0xff]   ;;  %v6321_v63 = vld [vmem:[#allocation7 + $0x244] ss:$16 sps:$4 sm:$0xff]  }
 0x182   :  { %2641 = vmatpush2.bf16.msra.mxu0 %v6226_v24  ;;  %v6275_v24 = vld [vmem:[#allocation5 + $0x788] ss:$28 sps:$4 sm:$0xff]  }
 0x183   :  { %5656 = vmatpush3.bf16.msra.mxu1 %v6230_v25  ;;  %2642 = vmatprep.subr.bf16.mxu0 %v6233_v26  ;;  %v6276_v25 = vld [vmem:[#allocation5 + $0x910] ss:$28 sps:$4 sm:$0xff]   ;;  %v6279_v26 = vld [vmem:[#allocation7 + $0x24] ss:$16 sps:$4 sm:$0xff]  }
 0x184   :  { %5657 = vmatprep.subr.bf16.mxu1 %v6234_v27  ;;  %v6277_v27 = vld [vmem:[#allocation7 + $0x20] ss:$16 sps:$4 sm:$0xff]  }
 0x186   :  { %2643 = vmatpush2.bf16.msra.mxu0 %v6231_v28  ;;  %v6281_v28 = vld [vmem:[#allocation5 + $0x8d8] ss:$28 sps:$4 sm:$0xff]  }
 0x187   :  { %5658 = vmatpush3.bf16.msra.mxu1 %v6235_v29  ;;  %2644 = vmatprep.subr.bf16.mxu0 %v6238_v30  ;;  %v6284_v29 = vld [vmem:[#allocation7 + $0x4] ss:$16 sps:$4 sm:$0xff]   ;;  %v6282_v30 = vld [vmem:[#allocation7] ss:$16 sps:$4 sm:$0xff]  }
 0x188   :  { %5659 = vmatprep.subr.bf16.mxu1 %v6239_v31  ;;  %v6285_v31 = vld [vmem:[#allocation5 + $0x718] ss:$28 sps:$4 sm:$0xff]  }
 0x18a   :  { %2645 = vmatpush2.bf16.msra.mxu0 %v6236_v34  ;;  %v511_v34 = vsub.s32 0, %v6900_v33 }
 0x18b   :  { %5660 = vmatpush3.bf16.msra.mxu1 %v6240_v35  ;;  %2646 = vmatprep.subr.bf16.mxu0 %v6243_v36  ;;  %v6288_v35 = vld [vmem:[#allocation7 + $0x1e4] ss:$16 sps:$4 sm:$0xff]  }
 0x18c   :  { %5661 = vmatprep.subr.bf16.mxu1 %v6244_v37  ;;  %v6291_v36 = vld [vmem:[#allocation7 + $0x2e4] ss:$16 sps:$4 sm:$0xff]   ;;  %v6286_v37 = vld [vmem:[#allocation7 + $0x1e0] ss:$16 sps:$4 sm:$0xff]   ;;  %v512_v0 = vrot.slane %v6902_v38, %v511_v34 }
 0x18e   :  { %2647 = vmatpush2.bf16.msra.mxu0 %v6241_v42  ;;  %v6294_v42 = vld [vmem:[#allocation7 + $0x1c4] ss:$16 sps:$4 sm:$0xff]  }
 0x18f   :  { %5662 = vmatpush3.bf16.msra.mxu1 %v6245_v43  ;;  %5669 = vmatprep.subr.bf16.mxu0 %v6246_v45  ;;  %v6297_v43 = vld [vmem:[#allocation7 + $0x2c4] ss:$16 sps:$4 sm:$0xff]   ;;  %v6292_v45 = vld [vmem:[#allocation7 + $0x1c0] ss:$16 sps:$4 sm:$0xff]  }
 0x190   :  { %4170 = vmatprep.subr.bf16.mxu1 %v6249_v46  ;;  %v6295_v46 = vld [vmem:[#allocation7 + $0x2c0] ss:$16 sps:$4 sm:$0xff]  }
 0x191   :  { %v6914_v60 = vpop.f32.mrf.mxu0  ;;  %2649 = vmatmul.mubr.bf16.vlgmr.msra.gmra.mxu0 %v6882_v23 }
 0x192   :  { %2733 = vmatmul.mubr.bf16.vlgmr.msra.gmra.mxu1 %v6874_v15  ;;  %5670 = vmatpush3.bf16.msra.mxu0 %v6250_v52  ;;  %v6301_v52 = vld [vmem:[#allocation7 + $0x2a0] ss:$16 sps:$4 sm:$0xff]  }
 0x193   :  { %4171 = vmatpush1.bf16.msra.mxu1 %v6247_v51  ;;  %v2394_v1 = vpop.f32.mrf.mxu0  ;;  %5671 = vmatprep.subr.bf16.mxu0 %v6251_v53  ;;  %v6298_v51 = vld [vmem:[#allocation7 + $0x1a0] ss:$16 sps:$4 sm:$0xff]   ;;  %v6306_v53 = vld [vmem:[#allocation7 + $0x184] ss:$16 sps:$4 sm:$0xff]  }
 0x194   :  { %4172 = vmatprep.subr.bf16.mxu1 %v6254_v54  ;;  %2773 = vmatprep.mubr.bf16.mxu0 %v6879_v44  ;;  %v2395_v15 = vadd.f32 %v2394_v1, %v2352_v2  ;;  %v6266_v44 = vld [vmem:[#allocation5 + $0x980] ss:$28 sps:$4 sm:$0xff]   ;;  %v6309_v54 = vld [vmem:[#allocation7 + $0x284] ss:$16 sps:$4 sm:$0xff]  }
 0x195   :  { %v6919_v5 = vpop.f32.mrf.mxu0  ;;  %v6316_v1 = vld [vmem:[#allocation7 + $0x140] ss:$16 sps:$4 sm:$0xff]  }
 0x196   :  { %5672 = vmatpush3.bf16.msra.mxu0 %v6255_v59  ;;  %v2783_v13 = vmax.f32 %v2395_v15, 0.0  ;;  %v6315_v59 = vld [vmem:[#allocation7 + $0x264] ss:$16 sps:$4 sm:$0xff]   ;;  %v6319_v2 = vld [vmem:[#allocation7 + $0x240] ss:$16 sps:$4 sm:$0xff]  }
 0x197   :  { %4173 = vmatpush1.bf16.msra.mxu1 %v6252_v58  ;;  %v2398_v9 = vpop.f32.mrf.mxu0  ;;  %5673 = vmatprep.subr.bf16.mxu0 %v6256_v61  ;;  %v6312_v58 = vld [vmem:[#allocation7 + $0x164] ss:$16 sps:$4 sm:$0xff]   ;;  %v6313_v61 = vld [vmem:[#allocation7 + $0x260] ss:$16 sps:$4 sm:$0xff]  }
 0x198   :  { %4174 = vmatprep.subr.bf16.mxu1 %v6259_v62  ;;  %v2399_v10 = vadd.f32 %v2398_v9, %v2356_v8  ;;  %v6318_v62 = vld [vmem:[#allocation7 + $0x144] ss:$16 sps:$4 sm:$0xff]   ;;  %v6931_v8 = vpop.f32.mrf.mxu1  ;;  %v6322_v9 = vld [vmem:[#allocation7 + $0x120] ss:$16 sps:$4 sm:$0xff]  }
 0x19a   :  { %v2790_v14 = vmax.f32 %v2399_v10, 0.0  ;;  %5674 = vmatpush3.bf16.msra.mxu0 %v6260_v4  ;;  %v6324_v4 = vld [vmem:[#allocation7 + $0x124] ss:$16 sps:$4 sm:$0xff]   ;;  %v6325_v10 = vld [vmem:[#allocation7 + $0x220] ss:$16 sps:$4 sm:$0xff]  }
 0x19b   :  { %4175 = vmatpush1.bf16.msra.mxu1 %v6257_v3  ;;  %5675 = vmatprep.subr.bf16.mxu0 %v6261_v6  ;;  %v2311_v3 = vadd.f32 %v6907_v47, %v512_v0  ;;  %v6327_v6 = vld [vmem:[#allocation7 + $0x224] ss:$16 sps:$4 sm:$0xff]  }
 0x19c   :  { %4176 = vmatprep.subr.bf16.mxu1 %v6264_v7  ;;  %v6921_v17 = vpack.c.bf16 %v2790_v14, %v2783_v13  ;;  %v2307_v7 = vadd.f32 %v6898_v32, %v512_v0  ;;  %v2437_v13 = vpop.f32.mrf.mxu1  ;;  %v6330_v14 = vld [vmem:[#allocation7 + $0x104] ss:$16 sps:$4 sm:$0xff]  }
 0x19d   :  { %v2354_v15 = vadd.f32 %v6912_v56, %v2311_v3  ;;  %v6328_v56 = vld [vmem:[#allocation7 + $0x100] ss:$16 sps:$4 sm:$0xff]  }
 0x19e   :  { %5676 = vmatpush3.bf16.msra.mxu0 %v6265_v16  ;;  %4202 = vmatprep.mubr.bf16.mxu1 %v6921_v17  ;;  %v6333_v16 = vld [vmem:[#allocation7 + $0x204] ss:$16 sps:$4 sm:$0xff]  }
 0x19f   :  { %4177 = vmatpush1.bf16.msra.mxu1 %v6262_v11  ;;  %5677 = vmatprep.subr.bf16.mxu0 %v6266_v44  ;;  %v2350_v11 = vadd.f32 %v6904_v40, %v2307_v7  ;;  %v2397_v47 = vadd.f32 %v6919_v5, %v2354_v15  ;;  %v523_v44 = vsub.s32 3, %v6900_v33  ;;  %v6336_v40 = vld [vmem:[#allocation7 + $0x3e4] ss:$16 sps:$4 sm:$0xff]  }
 0x1a0   :  { %4178 = vmatprep.subr.bf16.mxu1 %v6269_v18  ;;  %v6331_v18 = vld [vmem:[#allocation7 + $0x200] ss:$16 sps:$4 sm:$0xff]   ;;  %v6360_v5 = vld [vmem:[#allocation7 + $0x4e4] ss:$16 sps:$4 sm:$0xff]  }
 0x1a1   :  { %v2393_v32 = vadd.f32 %v6914_v60, %v2350_v11  ;;  %v6334_v60 = vld [vmem:[#allocation7 + $0x3e0] ss:$16 sps:$4 sm:$0xff]   ;;  %v6351_v7 = vld [vmem:[#allocation7 + $0x344] ss:$16 sps:$4 sm:$0xff]  }
 0x1a2   :  { %5678 = vmatpush3.bf16.msra.mxu0 %v6270_v20  ;;  %v6938_v20 = vpop.f32.mrf.mxu1  ;;  %v6375_v15 = vld [vmem:[#allocation7 + $0x444] ss:$16 sps:$4 sm:$0xff]   ;;  %v6373_v11 = vld [vmem:[#allocation7 + $0x440] ss:$16 sps:$4 sm:$0xff]  }
 0x1a3   :  { %4179 = vmatpush1.bf16.msra.mxu1 %v6267_v19  ;;  %5679 = vmatprep.subr.bf16.mxu0 %v6271_v21  ;;  %v2789_v19 = vmax.f32 %v2397_v47, 0.0  ;;  %v2782_v21 = vmax.f32 %v2393_v32, 0.0  ;;  %v6352_v32 = vld [vmem:[#allocation7 + $0x320] ss:$16 sps:$4 sm:$0xff]  }
 0x1a4   :  { %4180 = vmatprep.subr.bf16.mxu1 %v6274_v22  ;;  %v524_v22 = vrot.slane %v6902_v38, %v523_v44 }
 0x1a6   :  { %5680 = vmatpush3.bf16.msra.mxu0 %v6275_v24  ;;  %v6943_v24 = vpack.c.bf16 %v2789_v19, %v2782_v21  ;;  %v6357_v19 = vld [vmem:[#allocation7 + $0x304] ss:$16 sps:$4 sm:$0xff]  }
 0x1a7   :  { %4181 = vmatpush1.bf16.msra.mxu1 %v6272_v12  ;;  %5681 = vmatprep.subr.bf16.mxu0 %v6276_v25  ;;  %v6358_v12 = vld [vmem:[#allocation7 + $0x4e0] ss:$16 sps:$4 sm:$0xff]   ;;  %v2441_v25 = vpop.f32.mrf.mxu1 }
 0x1a8   :  { %4182 = vmatprep.subr.bf16.mxu1 %v6279_v26  ;;  %v6339_v26 = vld [vmem:[#allocation7 + $0x3c4] ss:$16 sps:$4 sm:$0xff]  }
 0x1aa   :  { %5682 = vmatpush3.bf16.msra.mxu0 %v6280_v55 }
 0x1ab   :  { %4183 = vmatpush1.bf16.msra.mxu1 %v6277_v27  ;;  %5683 = vmatprep.subr.bf16.mxu0 %v6281_v28  ;;  %v6363_v27 = vld [vmem:[#allocation7 + $0x4c4] ss:$16 sps:$4 sm:$0xff]  }
 0x1ac   :  { %4184 = vmatprep.subr.bf16.mxu1 %v6284_v29  ;;  %v2438_v29 = vadd.f32 %v2437_v13, %v524_v22  ;;  %v6354_v13 = vld [vmem:[#allocation7 + $0x324] ss:$16 sps:$4 sm:$0xff]  }
 0x1ae   :  { %5684 = vmatpush3.bf16.msra.mxu0 %v6285_v31  ;;  %v6361_v31 = vld [vmem:[#allocation7 + $0x4c0] ss:$16 sps:$4 sm:$0xff]  }
 0x1af   :  { %4185 = vmatpush1.bf16.msra.mxu1 %v6282_v30  ;;  %4213 = vmatprep.subr.bf16.mxu0 %v6291_v36  ;;  %v6337_v30 = vld [vmem:[#allocation7 + $0x3c0] ss:$16 sps:$4 sm:$0xff]  }
 0x1b0   :  { %4186 = vmatprep.subr.bf16.mxu1 %v6288_v35 }
 0x1b1   :  { %2774 = vmatmul.mubr.bf16.vlgmr.msra.gmra.mxu0 %v6882_v23  ;;  %v6310_v23 = vld [vmem:[#allocation7 + $0x160] ss:$16 sps:$4 sm:$0xff]  }
 0x1b2   :  { %4214 = vmatpush1.bf16.msra.mxu0 %v6289_v39  ;;  %v6366_v39 = vld [vmem:[#allocation7 + $0x4a4] ss:$16 sps:$4 sm:$0xff]  }
 0x1b3   :  { %4187 = vmatpush2.bf16.msra.mxu1 %v6286_v37  ;;  %4215 = vmatprep.subr.bf16.mxu0 %v6297_v43  ;;  %v6342_v37 = vld [vmem:[#allocation7 + $0x3a4] ss:$16 sps:$4 sm:$0xff]  }
 0x1b4   :  { %4188 = vmatprep.subr.bf16.mxu1 %v6294_v42 }
 0x1b6   :  { %4216 = vmatpush1.bf16.msra.mxu0 %v6295_v46  ;;  %v2442_v46 = vadd.f32 %v2441_v25, %v524_v22  ;;  %v6384_v22 = vld [vmem:[#allocation7 + $0x5e4] ss:$16 sps:$4 sm:$0xff]   ;;  %v6382_v25 = vld [vmem:[#allocation7 + $0x5e0] ss:$16 sps:$4 sm:$0xff]  }
 0x1b7   :  { %4189 = vmatpush2.bf16.msra.mxu1 %v6292_v45  ;;  %4217 = vmatprep.subr.bf16.mxu0 %v6303_v49  ;;  %v6364_v49 = vld [vmem:[#allocation7 + $0x4a0] ss:$16 sps:$4 sm:$0xff]  }
 0x1b8   :  { %4190 = vmatprep.subr.bf16.mxu1 %v6300_v48  ;;  %v6340_v48 = vld [vmem:[#allocation7 + $0x3a0] ss:$16 sps:$4 sm:$0xff]  }
 0x1ba   :  { %4218 = vmatpush1.bf16.msra.mxu0 %v6301_v52 }
 0x1bb   :  { %4191 = vmatpush2.bf16.msra.mxu1 %v6298_v51  ;;  %4219 = vmatprep.subr.bf16.mxu0 %v6309_v54  ;;  %v6369_v54 = vld [vmem:[#allocation7 + $0x484] ss:$16 sps:$4 sm:$0xff]  }
 0x1bc   :  { %4192 = vmatprep.subr.bf16.mxu1 %v6306_v53  ;;  %v6345_v53 = vld [vmem:[#allocation7 + $0x384] ss:$16 sps:$4 sm:$0xff]  }
 0x1be   :  { %4220 = vmatpush1.bf16.msra.mxu0 %v6307_v57 }
 0x1bf   :  { %4193 = vmatpush2.bf16.msra.mxu1 %v6304_v50  ;;  %4221 = vmatprep.subr.bf16.mxu0 %v6315_v59 }
 0x1c0   :  { %4194 = vmatprep.subr.bf16.mxu1 %v6312_v58  ;;  %v519_v58 = vsub.s32 2, %v6900_v33 }
 0x1c2   :  { %4222 = vmatpush1.bf16.msra.mxu0 %v6313_v61  ;;  %v6367_v61 = vld [vmem:[#allocation7 + $0x480] ss:$16 sps:$4 sm:$0xff]  }
 0x1c3   :  { %4195 = vmatpush2.bf16.msra.mxu1 %v6310_v23  ;;  %4223 = vmatprep.subr.bf16.mxu0 %v6321_v63  ;;  %v6343_v23 = vld [vmem:[#allocation7 + $0x380] ss:$16 sps:$4 sm:$0xff]   ;;  %v6372_v63 = vld [vmem:[#allocation7 + $0x464] ss:$16 sps:$4 sm:$0xff]  }
 0x1c4   :  { %4196 = vmatprep.subr.bf16.mxu1 %v6318_v62  ;;  %v6348_v62 = vld [vmem:[#allocation7 + $0x364] ss:$16 sps:$4 sm:$0xff]  }
 0x1c6   :  { %4224 = vmatpush1.bf16.msra.mxu0 %v6319_v2  ;;  %v520_v2 = vrot.slane %v6902_v38, %v519_v58 }
 0x1c7   :  { %4197 = vmatpush2.bf16.msra.mxu1 %v6316_v1  ;;  %4225 = vmatprep.subr.bf16.mxu0 %v6327_v6  ;;  %v6370_v6 = vld [vmem:[#allocation7 + $0x460] ss:$16 sps:$4 sm:$0xff]  }
 0x1c8   :  { %4198 = vmatprep.subr.bf16.mxu1 %v6324_v4  ;;  %v6346_v4 = vld [vmem:[#allocation7 + $0x360] ss:$16 sps:$4 sm:$0xff]   ;;  %v2436_v38 = vadd.f32 %v6931_v8, %v520_v2 }
 0x1c9   :  { %v6355_v8 = vld [vmem:[#allocation7 + $0x300] ss:$16 sps:$4 sm:$0xff]  }
 0x1ca   :  { %4226 = vmatpush1.bf16.msra.mxu0 %v6325_v10  ;;  %v6349_v10 = vld [vmem:[#allocation7 + $0x340] ss:$16 sps:$4 sm:$0xff]  }
 0x1cb   :  { %4199 = vmatpush2.bf16.msra.mxu1 %v6322_v9  ;;  %4227 = vmatprep.subr.bf16.mxu0 %v6333_v16  ;;  %v2440_v9 = vadd.f32 %v6938_v20, %v520_v2  ;;  %v6381_v20 = vld [vmem:[#allocation7 + $0x404] ss:$16 sps:$4 sm:$0xff]   ;;  %v6451_v2 = vld [vmem:[#allocation7 + $0x600] ss:$16 sps:$4 sm:$0xff]  }
 0x1cc   :  { %4200 = vmatprep.subr.bf16.mxu1 %v6330_v14  ;;  %v6378_v14 = vld [vmem:[#allocation7 + $0x424] ss:$16 sps:$4 sm:$0xff]  }
 0x1ce   :  { %4228 = vmatpush1.bf16.msra.mxu0 %v6331_v18 }
 0x1cf   :  { %4201 = vmatpush2.bf16.msra.mxu1 %v6328_v56  ;;  %4229 = vmatprep.subr.bf16.mxu0 %v6336_v40  ;;  %v6376_v56 = vld [vmem:[#allocation7 + $0x420] ss:$16 sps:$4 sm:$0xff]  }
 0x1d0   :  { %4256 = vmatprep.subr.bf16.mxu1 %v6360_v5  ;;  %v6379_v5 = vld [vmem:[#allocation7 + $0x400] ss:$16 sps:$4 sm:$0xff]  }
 0x1d1   :  { %v6945_v55 = vpop.f32.mrf.mxu0 }
 0x1d2   :  { %4203 = vmatmul.mubr.bf16.vlgmr.msra.gmra.mxu1 %v6943_v24  ;;  %v6948_v28 = vpop.f32.mrf.mxu1  ;;  %4230 = vmatpush2.bf16.msra.mxu0 %v6334_v60  ;;  %v2479_v16 = vadd.f32 %v6945_v55, %v2436_v38  ;;  %v6411_v60 = vld [vmem:[#allocation7 + $0x6e4] ss:$16 sps:$4 sm:$0xff]  }
 0x1d3   :  { %4257 = vmatpush1.bf16.msra.mxu1 %v6358_v12  ;;  %v2480_v35 = vpop.f32.mrf.mxu0  ;;  %4231 = vmatprep.subr.bf16.mxu0 %v6339_v26  ;;  %v6409_v26 = vld [vmem:[#allocation7 + $0x6e0] ss:$16 sps:$4 sm:$0xff]   ;;  %v6387_v55 = vld [vmem:[#allocation7 + $0x5c4] ss:$16 sps:$4 sm:$0xff]  }
 0x1d4   :  { %v2523_v36 = vpop.f32.mrf.mxu1  ;;  %4258 = vmatprep.subr.bf16.mxu1 %v6363_v27  ;;  %v2481_v42 = vadd.f32 %v2480_v35, %v2438_v29  ;;  %v2522_v40 = vadd.f32 %v6948_v28, %v2479_v16  ;;  %v6417_v28 = vld [vmem:[#allocation7 + $0x6c4] ss:$16 sps:$4 sm:$0xff]   ;;  %v6385_v29 = vld [vmem:[#allocation7 + $0x5c0] ss:$16 sps:$4 sm:$0xff]  }
 0x1d5   :  { %v2482_v43 = vpop.f32.mrf.mxu0  ;;  %v6423_v35 = vld [vmem:[#allocation7 + $0x6a4] ss:$16 sps:$4 sm:$0xff]  }
 0x1d6   :  { %v2525_v45 = vpop.f32.mrf.mxu1  ;;  %4232 = vmatpush2.bf16.msra.mxu0 %v6337_v30  ;;  %v2524_v50 = vadd.f32 %v2523_v36, %v2481_v42  ;;  %v2483_v47 = vadd.f32 %v2482_v43, %v2440_v9  ;;  %v2784_v12 = vmax.f32 %v2522_v40, 0.0  ;;  %v6415_v30 = vld [vmem:[#allocation7 + $0x6c0] ss:$16 sps:$4 sm:$0xff]   ;;  %v6429_v42 = vld [vmem:[#allocation7 + $0x684] ss:$16 sps:$4 sm:$0xff]  }
 0x1d7   :  { %4259 = vmatpush1.bf16.msra.mxu1 %v6361_v31  ;;  %v2484_v51 = vpop.f32.mrf.mxu0  ;;  %4233 = vmatprep.subr.bf16.mxu0 %v6342_v37  ;;  %v6390_v31 = vld [vmem:[#allocation7 + $0x5a4] ss:$16 sps:$4 sm:$0xff]   ;;  %v6388_v36 = vld [vmem:[#allocation7 + $0x5a0] ss:$16 sps:$4 sm:$0xff]  }
 0x1d8   :  { %v2527_v52 = vpop.f32.mrf.mxu1  ;;  %4260 = vmatprep.subr.bf16.mxu1 %v6366_v39  ;;  %v2485_v57 = vadd.f32 %v2484_v51, %v2442_v46  ;;  %v2785_v0 = vmax.f32 %v2524_v50, 0.0  ;;  %v2526_v18 = vadd.f32 %v2525_v45, %v2483_v47  ;;  %v6421_v37 = vld [vmem:[#allocation7 + $0x6a0] ss:$16 sps:$4 sm:$0xff]   ;;  %v6393_v39 = vld [vmem:[#allocation7 + $0x584] ss:$16 sps:$4 sm:$0xff]  }
 0x1d9   :  { %v6391_v43 = vld [vmem:[#allocation7 + $0x580] ss:$16 sps:$4 sm:$0xff]   ;;  %v6396_v46 = vld [vmem:[#allocation7 + $0x564] ss:$16 sps:$4 sm:$0xff]  }
 0x1da   :  { %v2528_v59 = vadd.f32 %v2527_v52, %v2485_v57  ;;  %4234 = vmatpush2.bf16.msra.mxu0 %v6340_v48  ;;  %v2791_v21 = vmax.f32 %v2526_v18, 0.0  ;;  %v6427_v45 = vld [vmem:[#allocation7 + $0x680] ss:$16 sps:$4 sm:$0xff]   ;;  %v6435_v48 = vld [vmem:[#allocation7 + $0x664] ss:$16 sps:$4 sm:$0xff]  }
 0x1db   :  { %4261 = vmatpush1.bf16.msra.mxu1 %v6364_v49  ;;  %4235 = vmatprep.subr.bf16.mxu0 %v6345_v53  ;;  %v6394_v49 = vld [vmem:[#allocation7 + $0x560] ss:$16 sps:$4 sm:$0xff]   ;;  %v6399_v52 = vld [vmem:[#allocation7 + $0x544] ss:$16 sps:$4 sm:$0xff]  }
 0x1dc   :  { %4262 = vmatprep.subr.bf16.mxu1 %v6369_v54  ;;  %v2792_v1 = vmax.f32 %v2528_v59, 0.0  ;;  %v6961_v27 = vpack.c.bf16 %v2791_v21, %v2784_v12  ;;  %v6433_v51 = vld [vmem:[#allocation7 + $0x660] ss:$16 sps:$4 sm:$0xff]   ;;  %v6441_v53 = vld [vmem:[#allocation7 + $0x644] ss:$16 sps:$4 sm:$0xff]   ;;  %v6803_v54 = vmov 0  }
 0x1dd   :  { %v6397_v50 = vld [vmem:[#allocation7 + $0x540] ss:$16 sps:$4 sm:$0xff]   ;;  %v6402_v59 = vld [vmem:[#allocation7 + $0x524] ss:$16 sps:$4 sm:$0xff]  }
 0x1de   :  { %v6954_v3 = vpack.c.bf16 %v2792_v1, %v2785_v0  ;;  %4236 = vmatpush2.bf16.msra.mxu0 %v6343_v23  ;;  %v6439_v57 = vld [vmem:[#allocation7 + $0x640] ss:$16 sps:$4 sm:$0xff]   ;;  %v6447_v23 = vld [vmem:[#allocation7 + $0x624] ss:$16 sps:$4 sm:$0xff]  }
 0x1df   :  { %4263 = vmatpush1.bf16.msra.mxu1 %v6367_v61  ;;  %4237 = vmatprep.subr.bf16.mxu0 %v6348_v62  ;;  %v6400_v61 = vld [vmem:[#allocation7 + $0x520] ss:$16 sps:$4 sm:$0xff]   ;;  %v6453_v0 = vld [vmem:[#allocation7 + $0x604] ss:$16 sps:$4 sm:$0xff]  }
 0x1e0   :  { %4264 = vmatprep.subr.bf16.mxu1 %v6372_v63  ;;  %4245 = vmatprep.mubr.bf16.mxu0 %v6954_v3  ;;  %v6445_v62 = vld [vmem:[#allocation7 + $0x620] ss:$16 sps:$4 sm:$0xff]   ;;  %v6405_v63 = vld [vmem:[#allocation7 + $0x504] ss:$16 sps:$4 sm:$0xff]  }
 0x1e1   :  { %v6403_v1 = vld [vmem:[#allocation7 + $0x500] ss:$16 sps:$4 sm:$0xff]  }
 0x1e2   :  { %4238 = vmatpush2.bf16.msra.mxu0 %v6346_v4  ;;  %v6408_v4 = vld [vmem:[#allocation7 + $0x2ec] ss:$16 sps:$4 sm:$0xff]  }
 0x1e3   :  { %4265 = vmatpush1.bf16.msra.mxu1 %v6370_v6  ;;  %4239 = vmatprep.subr.bf16.mxu0 %v6351_v7  ;;  %v6459_v6 = vld [vmem:[#allocation7 + $0xec] ss:$16 sps:$4 sm:$0xff]  }
 0x1e4   :  { %4266 = vmatprep.subr.bf16.mxu1 %v6375_v15 }
 0x1e6   :  { %4240 = vmatpush2.bf16.msra.mxu0 %v6349_v10  ;;  %v531_v10 = vsub.s32 5, %v6900_v33 }
 0x1e7   :  { %4267 = vmatpush1.bf16.msra.mxu1 %v6373_v11  ;;  %4241 = vmatprep.subr.bf16.mxu0 %v6354_v13  ;;  %v527_v11 = vsub.s32 4, %v6900_v33  ;;  %v6638_v13 = vld [vmem:[#allocation11] ss:$4 sm:$0xff] }
 0x1e8   :  { %4268 = vmatprep.subr.bf16.mxu1 %v6378_v14  ;;  %v532_v14 = vrot.slane %v6638_v13, %v531_v10  ;;  %v6444_v10 = vld [vmem:[#allocation7 + $0x22c] ss:$16 sps:$4 sm:$0xff]  }
 0x1e9   :  { %v528_v16 = vrot.slane %v6638_v13, %v527_v11 }
 0x1ea   :  { %4242 = vmatpush2.bf16.msra.mxu0 %v6352_v32 }
 0x1eb   :  { %4269 = vmatpush1.bf16.msra.mxu1 %v6376_v56  ;;  %4243 = vmatprep.subr.bf16.mxu0 %v6357_v19 }
 0x1ec   :  { %4270 = vmatprep.subr.bf16.mxu1 %v6381_v20 }
 0x1ee   :  { %4244 = vmatpush2.bf16.msra.mxu0 %v6355_v8 }
 0x1ef   :  { %4271 = vmatpush1.bf16.msra.mxu1 %v6379_v5  ;;  %4299 = vmatprep.subr.bf16.mxu0 %v6411_v60 }
 0x1f0   :  { %4272 = vmatprep.subr.bf16.mxu1 %v6384_v22 }
 0x1f1   :  { %4246 = vmatmul.mubr.bf16.vlgmr.msra.gmra.mxu0 %v6961_v27 }
 0x1f2   :  { %4300 = vmatpush1.bf16.msra.mxu0 %v6409_v26  ;;  %4331 = vmatprep.mubr.bf16.mxu0 %v6803_v54 }
 0x1f3   :  { %4273 = vmatpush2.bf16.msra.mxu1 %v6382_v25  ;;  %4301 = vmatprep.subr.bf16.mxu0 %v6417_v28 }
 0x1f4   :  { %4274 = vmatprep.subr.bf16.mxu1 %v6387_v55 }
 0x1f6   :  { %4302 = vmatpush1.bf16.msra.mxu0 %v6415_v30 }
 0x1f7   :  { %4275 = vmatpush2.bf16.msra.mxu1 %v6385_v29  ;;  %4303 = vmatprep.subr.bf16.mxu0 %v6423_v35 }
 0x1f8   :  { %4276 = vmatprep.subr.bf16.mxu1 %v6390_v31 }
 0x1fa   :  { %4304 = vmatpush1.bf16.msra.mxu0 %v6421_v37 }
 0x1fb   :  { %4277 = vmatpush2.bf16.msra.mxu1 %v6388_v36  ;;  %4305 = vmatprep.subr.bf16.mxu0 %v6429_v42 }
 0x1fc   :  { %4278 = vmatprep.subr.bf16.mxu1 %v6393_v39 }
 0x1fe   :  { %4306 = vmatpush1.bf16.msra.mxu0 %v6427_v45 }
 0x1ff   :  { %4279 = vmatpush2.bf16.msra.mxu1 %v6391_v43  ;;  %4307 = vmatprep.subr.bf16.mxu0 %v6435_v48 }
 0x200   :  { %4280 = vmatprep.subr.bf16.mxu1 %v6396_v46  ;;  %v6406_v46 = vld [vmem:[#allocation7 + $0x2e8] ss:$16 sps:$4 sm:$0xff]  }
 0x202   :  { %4308 = vmatpush1.bf16.msra.mxu0 %v6433_v51  ;;  %v6414_v51 = vld [vmem:[#allocation7 + $0x2cc] ss:$16 sps:$4 sm:$0xff]  }
 0x203   :  { %4281 = vmatpush2.bf16.msra.mxu1 %v6394_v49  ;;  %4309 = vmatprep.subr.bf16.mxu0 %v6441_v53 }
 0x204   :  { %4282 = vmatprep.subr.bf16.mxu1 %v6399_v52  ;;  %v6412_v52 = vld [vmem:[#allocation7 + $0x2c8] ss:$16 sps:$4 sm:$0xff]  }
 0x206   :  { %4310 = vmatpush1.bf16.msra.mxu0 %v6439_v57  ;;  %v6418_v57 = vld [vmem:[#allocation7 + $0x2a8] ss:$16 sps:$4 sm:$0xff]  }
 0x207   :  { %4283 = vmatpush2.bf16.msra.mxu1 %v6397_v50  ;;  %4311 = vmatprep.subr.bf16.mxu0 %v6447_v23  ;;  %v6420_v50 = vld [vmem:[#allocation7 + $0x2ac] ss:$16 sps:$4 sm:$0xff]  }
 0x208   :  { %4284 = vmatprep.subr.bf16.mxu1 %v6402_v59  ;;  %v6426_v23 = vld [vmem:[#allocation7 + $0x28c] ss:$16 sps:$4 sm:$0xff]  }
 0x20a   :  { %4312 = vmatpush1.bf16.msra.mxu0 %v6445_v62 }
 0x20b   :  { %4285 = vmatpush2.bf16.msra.mxu1 %v6400_v61  ;;  %4313 = vmatprep.subr.bf16.mxu0 %v6453_v0  ;;  %v6424_v61 = vld [vmem:[#allocation7 + $0x288] ss:$16 sps:$4 sm:$0xff]   ;;  %v535_v0 = vsub.s32 6, %v6900_v33 }
 0x20c   :  { %4286 = vmatprep.subr.bf16.mxu1 %v6405_v63  ;;  %v6432_v63 = vld [vmem:[#allocation7 + $0x26c] ss:$16 sps:$4 sm:$0xff]  }
 0x20e   :  { %4314 = vmatpush1.bf16.msra.mxu0 %v6451_v2 }
 0x20f   :  { %4287 = vmatpush2.bf16.msra.mxu1 %v6403_v1  ;;  %4342 = vmatprep.subr.bf16.mxu0 %v6459_v6  ;;  %v6430_v1 = vld [vmem:[#allocation7 + $0x268] ss:$16 sps:$4 sm:$0xff]  }
 0x210   :  { %4385 = vmatprep.subr.bf16.mxu1 %v6408_v4  ;;  %v536_v4 = vrot.slane %v6638_v13, %v535_v0  ;;  %v6495_v0 = vld [vmem:[#allocation7 + $0x2c] ss:$16 sps:$4 sm:$0xff]  }
 0x211   :  { %v2564_v7 = vpop.f32.mrf.mxu0 }
 0x212   :  { %v2607_v9 = vpop.f32.mrf.mxu1  ;;  %v2565_v20 = vadd.f32 %v2564_v7, %v528_v16  ;;  %v6436_v7 = vld [vmem:[#allocation7 + $0x248] ss:$16 sps:$4 sm:$0xff]  }
 0x213   :  { %v2566_v15 = vpop.f32.mrf.mxu0 }
 0x214   :  { %v2609_v47 = vpop.f32.mrf.mxu1  ;;  %v2567_v18 = vadd.f32 %v2566_v15, %v532_v14  ;;  %v2608_v12 = vadd.f32 %v2607_v9, %v2565_v20 }
 0x215   :  { %v2568_v38 = vpop.f32.mrf.mxu0 }
 0x216   :  { %v2611_v56 = vpop.f32.mrf.mxu1  ;;  %v2569_v19 = vadd.f32 %v2568_v38, %v528_v16  ;;  %v2610_v22 = vadd.f32 %v2609_v47, %v2567_v18 }
 0x217   :  { %v2570_v32 = vpop.f32.mrf.mxu0 }
 0x218   :  { %v2571_v8 = vadd.f32 %v2570_v32, %v532_v14  ;;  %v2613_v5 = vpop.f32.mrf.mxu1  ;;  %v2612_v60 = vadd.f32 %v2611_v56, %v2569_v19  ;;  %v6442_v56 = vld [vmem:[#allocation7 + $0x228] ss:$16 sps:$4 sm:$0xff]   ;;  %v6450_v19 = vld [vmem:[#allocation7 + $0x20c] ss:$16 sps:$4 sm:$0xff]  }
 0x21a   :  { %v2614_v55 = vadd.f32 %v2613_v5, %v2571_v8 }
 0x232   :  { %v5641_v25 = vpop.f32.mrf.mxu1 }
 0x234   :  { %v5642_v36 = vpop.f32.mrf.mxu1 }
 0x235   :  { %v5643_v6 = vadd.f32 %v5642_v36, %v5641_v25  ;;  %v6463_v36 = vld [vmem:[#allocation7 + $0xc8] ss:$16 sps:$4 sm:$0xff]  }
 0x236   :  { %v5644_v48 = vpop.f32.mrf.mxu1 }
 0x237   :  { %v2694_v11 = vadd.f32 %v5643_v6, %v536_v4  ;;  %v6496_v6 = vld [vmem:[#allocation7 + $0x308] ss:$16 sps:$4 sm:$0xff]  }
 0x238   :  { %v5645_v53 = vpop.f32.mrf.mxu1 }
 0x239   :  { %v5646_v38 = vadd.f32 %v5645_v53, %v5644_v48  ;;  %v6477_v48 = vld [vmem:[#allocation7 + $0x8c] ss:$16 sps:$4 sm:$0xff]  }
 0x23a   :  { %v6480_v53 = vld [vmem:[#allocation7 + $0x36c] ss:$16 sps:$4 sm:$0xff]  }
 0x23b   :  { %v2697_v20 = vadd.f32 %v5646_v38, %v536_v4  ;;  %v6501_v4 = vld [vmem:[#allocation7 + $0xc] ss:$16 sps:$4 sm:$0xff]  }
 0x23c   :  { %v6510_v38 = vld [vmem:[#allocation7 + $0x6cc] ss:$16 sps:$4 sm:$0xff]  }
 0x251   :  { %v2650_v40 = vpop.f32.mrf.mxu0 }
 0x252   :  { %v2651_v30 = vadd.f32 %v2650_v40, %v2608_v12  ;;  %v5663_v59 = vpop.f32.mrf.mxu1 }
 0x253   :  { %v2652_v21 = vpop.f32.mrf.mxu0 }
 0x254   :  { %v2653_v28 = vadd.f32 %v2652_v21, %v2610_v22  ;;  %v2786_v43 = vmax.f32 %v2651_v30, 0.0  ;;  %v5664_v62 = vpop.f32.mrf.mxu1  ;;  %v6448_v22 = vld [vmem:[#allocation7 + $0x208] ss:$16 sps:$4 sm:$0xff]   ;;  %v6462_v30 = vld [vmem:[#allocation7 + $0x3cc] ss:$16 sps:$4 sm:$0xff]  }
 0x255   :  { %v2654_v26 = vpop.f32.mrf.mxu0  ;;  %v5665_v47 = vadd.f32 %v5664_v62, %v5663_v59  ;;  %v6486_v59 = vld [vmem:[#allocation7 + $0x34c] ss:$16 sps:$4 sm:$0xff]   ;;  %v6487_v62 = vld [vmem:[#allocation7 + $0x48] ss:$16 sps:$4 sm:$0xff]  }
 0x256   :  { %v2655_v29 = vadd.f32 %v2654_v26, %v2612_v60  ;;  %v2787_v39 = vmax.f32 %v2653_v28, 0.0  ;;  %v5666_v2 = vpop.f32.mrf.mxu1  ;;  %v6456_v60 = vld [vmem:[#allocation7 + $0x3ec] ss:$16 sps:$4 sm:$0xff]   ;;  %v6457_v28 = vld [vmem:[#allocation7 + $0xe8] ss:$16 sps:$4 sm:$0xff]  }
 0x257   :  { %v2656_v31 = vpop.f32.mrf.mxu0  ;;  %v2735_v13 = vadd.f32 %v5665_v47, %v2694_v11  ;;  %v6505_v11 = vld [vmem:[#allocation7 + $0x1e8] ss:$16 sps:$4 sm:$0xff]   ;;  %v6513_v47 = vld [vmem:[#allocation7 + $0x1cc] ss:$16 sps:$4 sm:$0xff]  }
 0x258   :  { %v2657_v35 = vadd.f32 %v2656_v31, %v2614_v55  ;;  %v2793_v37 = vmax.f32 %v2655_v29, 0.0  ;;  %v5667_v15 = vpop.f32.mrf.mxu1  ;;  %v6454_v55 = vld [vmem:[#allocation7 + $0x3e8] ss:$16 sps:$4 sm:$0xff]   ;;  %v6465_v31 = vld [vmem:[#allocation7 + $0xcc] ss:$16 sps:$4 sm:$0xff]  }
 0x259   :  { %v5668_v16 = vadd.f32 %v5667_v15, %v5666_v2  ;;  %v6493_v2 = vld [vmem:[#allocation7 + $0x28] ss:$16 sps:$4 sm:$0xff]   ;;  %v6504_v15 = vld [vmem:[#allocation7 + $0x6ec] ss:$16 sps:$4 sm:$0xff]  }
 0x25a   :  { %v2794_v42 = vmax.f32 %v2657_v35, 0.0  ;;  %v6969_v49 = vpack.c.bf16 %v2793_v37, %v2786_v43  ;;  %v6460_v35 = vld [vmem:[#allocation7 + $0x3c8] ss:$16 sps:$4 sm:$0xff]   ;;  %v6468_v37 = vld [vmem:[#allocation7 + $0x3ac] ss:$16 sps:$4 sm:$0xff]  }
 0x25b   :  { %v2738_v8 = vadd.f32 %v5668_v16, %v2697_v20  ;;  %v6469_v43 = vld [vmem:[#allocation7 + $0xa8] ss:$16 sps:$4 sm:$0xff]   ;;  %v6522_v20 = vld [vmem:[#allocation7 + $0x68c] ss:$16 sps:$4 sm:$0xff]  }
 0x25c   :  { %v6967_v45 = vpack.c.bf16 %v2794_v42, %v2787_v39  ;;  %v6471_v39 = vld [vmem:[#allocation7 + $0xac] ss:$16 sps:$4 sm:$0xff]   ;;  %v6466_v42 = vld [vmem:[#allocation7 + $0x3a8] ss:$16 sps:$4 sm:$0xff]  }
 0x25d   :  { %v6511_v16 = vld [vmem:[#allocation7 + $0x1c8] ss:$16 sps:$4 sm:$0xff]  }
 0x25e   :  { %4288 = vmatprep.mubr.bf16.mxu1 %v6967_v45 }
 0x25f   :  { %4289 = vmatmul.mubr.bf16.vlgmr.msra.gmra.mxu1 %v6969_v49 }
 0x260   :  { %4386 = vmatpush1.bf16.msra.mxu1 %v6406_v46  ;;  %4417 = vmatprep.mubr.bf16.mxu1 %v6954_v3  ;;  %v6438_v3 = vld [vmem:[#allocation7 + $0x24c] ss:$16 sps:$4 sm:$0xff]  }
 0x261   :  { %4387 = vmatprep.subr.bf16.mxu1 %v6414_v51  ;;  %v6474_v46 = vld [vmem:[#allocation7 + $0x38c] ss:$16 sps:$4 sm:$0xff]   ;;  %v6472_v51 = vld [vmem:[#allocation7 + $0x388] ss:$16 sps:$4 sm:$0xff]  }
 0x264   :  { %4388 = vmatpush1.bf16.msra.mxu1 %v6412_v52  ;;  %v6475_v52 = vld [vmem:[#allocation7 + $0x88] ss:$16 sps:$4 sm:$0xff]  }
 0x265   :  { %4389 = vmatprep.subr.bf16.mxu1 %v6420_v50  ;;  %v6478_v50 = vld [vmem:[#allocation7 + $0x368] ss:$16 sps:$4 sm:$0xff]  }
 0x268   :  { %4390 = vmatpush1.bf16.msra.mxu1 %v6418_v57  ;;  %v6481_v57 = vld [vmem:[#allocation7 + $0x68] ss:$16 sps:$4 sm:$0xff]  }
 0x269   :  { %4391 = vmatprep.subr.bf16.mxu1 %v6426_v23  ;;  %v6489_v23 = vld [vmem:[#allocation7 + $0x4c] ss:$16 sps:$4 sm:$0xff]  }
 0x26c   :  { %4392 = vmatpush1.bf16.msra.mxu1 %v6424_v61  ;;  %v6484_v61 = vld [vmem:[#allocation7 + $0x348] ss:$16 sps:$4 sm:$0xff]  }
 0x26d   :  { %4393 = vmatprep.subr.bf16.mxu1 %v6432_v63  ;;  %v6492_v63 = vld [vmem:[#allocation7 + $0x32c] ss:$16 sps:$4 sm:$0xff]  }
 0x270   :  { %4394 = vmatpush1.bf16.msra.mxu1 %v6430_v1  ;;  %v6490_v1 = vld [vmem:[#allocation7 + $0x328] ss:$16 sps:$4 sm:$0xff]  }
 0x271   :  { %v5685_v9 = vpop.f32.mrf.mxu0  ;;  %4395 = vmatprep.subr.bf16.mxu1 %v6438_v3  ;;  %v6498_v3 = vld [vmem:[#allocation7 + $0x30c] ss:$16 sps:$4 sm:$0xff]  }
 0x273   :  { %v5686_v14 = vpop.f32.mrf.mxu0 }
 0x274   :  { %v5687_v32 = vadd.f32 %v5686_v14, %v5685_v9  ;;  %4396 = vmatpush1.bf16.msra.mxu1 %v6436_v7  ;;  %v6499_v7 = vld [vmem:[#allocation7 + $0x8] ss:$16 sps:$4 sm:$0xff]   ;;  %v6507_v9 = vld [vmem:[#allocation7 + $0x1ec] ss:$16 sps:$4 sm:$0xff]  }
 0x275   :  { %v5688_v18 = vpop.f32.mrf.mxu0  ;;  %4397 = vmatprep.subr.bf16.mxu1 %v6444_v10  ;;  %v6502_v10 = vld [vmem:[#allocation7 + $0x6e8] ss:$16 sps:$4 sm:$0xff]  }
 0x276   :  { %v2776_v5 = vadd.f32 %v5687_v32, %v2735_v13  ;;  %v6508_v14 = vld [vmem:[#allocation7 + $0x6c8] ss:$16 sps:$4 sm:$0xff]   ;;  %v6516_v32 = vld [vmem:[#allocation7 + $0x6ac] ss:$16 sps:$4 sm:$0xff]  }
 0x277   :  { %v5689_v40 = vpop.f32.mrf.mxu0  ;;  %v6525_v13 = vld [vmem:[#allocation7 + $0x18c] ss:$16 sps:$4 sm:$0xff]  }
 0x278   :  { %v5690_v21 = vadd.f32 %v5689_v40, %v5688_v18  ;;  %4398 = vmatpush1.bf16.msra.mxu1 %v6442_v56  ;;  %v2788_v25 = vmax.f32 %v2776_v5, 0.0  ;;  %v6519_v56 = vld [vmem:[#allocation7 + $0x1ac] ss:$16 sps:$4 sm:$0xff]   ;;  %v6514_v18 = vld [vmem:[#allocation7 + $0x6a8] ss:$16 sps:$4 sm:$0xff]  }
 0x279   :  { %4399 = vmatprep.subr.bf16.mxu1 %v6450_v19  ;;  %v6517_v19 = vld [vmem:[#allocation7 + $0x1a8] ss:$16 sps:$4 sm:$0xff]  }
 0x27a   :  { %v2779_v12 = vadd.f32 %v5690_v21, %v2738_v8  ;;  %v6523_v40 = vld [vmem:[#allocation7 + $0x188] ss:$16 sps:$4 sm:$0xff]   ;;  %v6531_v8 = vld [vmem:[#allocation7 + $0x16c] ss:$16 sps:$4 sm:$0xff]  }
 0x27b   :  { %v6526_v5 = vld [vmem:[#allocation7 + $0x668] ss:$16 sps:$4 sm:$0xff]  }
 0x27c   :  { %v2795_v26 = vmax.f32 %v2779_v12, 0.0  ;;  %4400 = vmatpush1.bf16.msra.mxu1 %v6448_v22  ;;  %v6529_v21 = vld [vmem:[#allocation7 + $0x168] ss:$16 sps:$4 sm:$0xff]   ;;  %v6534_v22 = vld [vmem:[#allocation7 + $0x64c] ss:$16 sps:$4 sm:$0xff]  }
 0x27d   :  { %4401 = vmatprep.subr.bf16.mxu1 %v6456_v60  ;;  %v6537_v60 = vld [vmem:[#allocation7 + $0x14c] ss:$16 sps:$4 sm:$0xff]   ;;  %v6532_v12 = vld [vmem:[#allocation7 + $0x648] ss:$16 sps:$4 sm:$0xff]  }
 0x27e   :  { %v6975_v29 = vpack.c.bf16 %v2795_v26, %v2788_v25  ;;  %v6535_v25 = vld [vmem:[#allocation7 + $0x148] ss:$16 sps:$4 sm:$0xff]   ;;  %v6540_v26 = vld [vmem:[#allocation7 + $0x62c] ss:$16 sps:$4 sm:$0xff]  }
 0x280   :  { %4402 = vmatpush2.bf16.msra.mxu1 %v6454_v55  ;;  %4332 = vmatmul.mubr.bf16.vlgmr.msra.gmra.mxu0 %v6975_v29  ;;  %v6543_v55 = vld [vmem:[#allocation7 + $0x12c] ss:$16 sps:$4 sm:$0xff]  }
 0x281   :  { %4343 = vmatpush1.bf16.msra.mxu0 %v6457_v28  ;;  %4374 = vmatprep.mubr.bf16.mxu0 %v6921_v17  ;;  %v6483_v17 = vld [vmem:[#allocation7 + $0x6c] ss:$16 sps:$4 sm:$0xff]   ;;  %v6538_v28 = vld [vmem:[#allocation7 + $0x628] ss:$16 sps:$4 sm:$0xff]  }
 0x282   :  { %4403 = vmatprep.subr.bf16.mxu1 %v6462_v30  ;;  %4344 = vmatprep.subr.bf16.mxu0 %v6465_v31  ;;  %v6541_v30 = vld [vmem:[#allocation7 + $0x128] ss:$16 sps:$4 sm:$0xff]   ;;  %v6546_v31 = vld [vmem:[#allocation7 + $0x60c] ss:$16 sps:$4 sm:$0xff]  }
 0x284   :  { %4404 = vmatpush2.bf16.msra.mxu1 %v6460_v35  ;;  %v6549_v35 = vld [vmem:[#allocation7 + $0x10c] ss:$16 sps:$4 sm:$0xff]  }
 0x285   :  { %4345 = vmatpush1.bf16.msra.mxu0 %v6463_v36  ;;  %4405 = vmatprep.subr.bf16.mxu1 %v6468_v37  ;;  %v6544_v36 = vld [vmem:[#allocation7 + $0x608] ss:$16 sps:$4 sm:$0xff]  }
 0x286   :  { %4346 = vmatprep.subr.bf16.mxu0 %v6471_v39  ;;  %v6547_v37 = vld [vmem:[#allocation7 + $0x108] ss:$16 sps:$4 sm:$0xff]  }
 0x287   :  { %v6598_v39 = vld [vmem:[#allocation8 + $0x78] sm:$0xff]  }
 0x288   :  { %4406 = vmatpush2.bf16.msra.mxu1 %v6466_v42  ;;  %v6552_v42 = vld [vmem:[#allocation7 + $0x4ec] ss:$16 sps:$4 sm:$0xff]  }
 0x289   :  { %4347 = vmatpush1.bf16.msra.mxu0 %v6469_v43  ;;  %4407 = vmatprep.subr.bf16.mxu1 %v6474_v46  ;;  %v6599_v43 = vld [vmem:[#allocation8 + $0x38] sm:$0xff]  }
 0x28a   :  { %4348 = vmatprep.subr.bf16.mxu0 %v6477_v48  ;;  %v6550_v46 = vld [vmem:[#allocation7 + $0x4e8] ss:$16 sps:$4 sm:$0xff]   ;;  %v6555_v48 = vld [vmem:[#allocation7 + $0x4cc] ss:$16 sps:$4 sm:$0xff]  }
 0x28c   :  { %4408 = vmatpush2.bf16.msra.mxu1 %v6472_v51  ;;  %v6600_v51 = vld [vmem:[#allocation8 + $0x70] sm:$0xff]  }
 0x28d   :  { %4349 = vmatpush1.bf16.msra.mxu0 %v6475_v52  ;;  %4409 = vmatprep.subr.bf16.mxu1 %v6480_v53  ;;  %v6601_v52 = vld [vmem:[#allocation8 + $0x30] sm:$0xff]   ;;  %v6553_v53 = vld [vmem:[#allocation7 + $0x4c8] ss:$16 sps:$4 sm:$0xff]  }
 0x28e   :  { %4350 = vmatprep.subr.bf16.mxu0 %v6483_v17  ;;  %v6602_v17 = vld [vmem:[#allocation8 + $0x68] sm:$0xff]  }
 0x290   :  { %4410 = vmatpush2.bf16.msra.mxu1 %v6478_v50  ;;  %v6558_v50 = vld [vmem:[#allocation7 + $0x4ac] ss:$16 sps:$4 sm:$0xff]  }
 0x291   :  { %4351 = vmatpush1.bf16.msra.mxu0 %v6481_v57  ;;  %4411 = vmatprep.subr.bf16.mxu1 %v6486_v59  ;;  %v6603_v57 = vld [vmem:[#allocation8 + $0x28] sm:$0xff]  }
 0x292   :  { %4352 = vmatprep.subr.bf16.mxu0 %v6489_v23  ;;  %v6556_v59 = vld [vmem:[#allocation7 + $0x4a8] ss:$16 sps:$4 sm:$0xff]   ;;  %v6604_v23 = vld [vmem:[#allocation8 + $0x60] sm:$0xff]  }
 0x294   :  { %4412 = vmatpush2.bf16.msra.mxu1 %v6484_v61  ;;  %v6559_v61 = vld [vmem:[#allocation7 + $0x488] ss:$16 sps:$4 sm:$0xff]  }
 0x295   :  { %4353 = vmatpush1.bf16.msra.mxu0 %v6487_v62  ;;  %4413 = vmatprep.subr.bf16.mxu1 %v6492_v63  ;;  %v6606_v62 = vld [vmem:[#allocation8 + $0x58] sm:$0xff]  }
 0x296   :  { %4354 = vmatprep.subr.bf16.mxu0 %v6495_v0  ;;  %v6607_v63 = vld [vmem:[#allocation8 + $0x18] sm:$0xff]  }
 0x297   :  { %v6562_v0 = vld [vmem:[#allocation7 + $0x468] ss:$16 sps:$4 sm:$0xff]  }
 0x298   :  { %4414 = vmatpush2.bf16.msra.mxu1 %v6490_v1  ;;  %v6608_v1 = vld [vmem:[#allocation8 + $0x50] sm:$0xff]  }
 0x299   :  { %4355 = vmatpush1.bf16.msra.mxu0 %v6493_v2  ;;  %4415 = vmatprep.subr.bf16.mxu1 %v6498_v3  ;;  %v6567_v2 = vld [vmem:[#allocation7 + $0x44c] ss:$16 sps:$4 sm:$0xff]   ;;  %v6609_v3 = vld [vmem:[#allocation8 + $0x10] sm:$0xff]  }
 0x29a   :  { %4356 = vmatprep.subr.bf16.mxu0 %v6501_v4  ;;  %v6565_v4 = vld [vmem:[#allocation7 + $0x448] ss:$16 sps:$4 sm:$0xff]  }
 0x29c   :  { %4416 = vmatpush2.bf16.msra.mxu1 %v6496_v6  ;;  %v6610_v6 = vld [vmem:[#allocation8 + $0x48] sm:$0xff]  }
 0x29d   :  { %4357 = vmatpush1.bf16.msra.mxu0 %v6499_v7  ;;  %4471 = vmatprep.subr.bf16.mxu1 %v6504_v15  ;;  %v6570_v7 = vld [vmem:[#allocation7 + $0x42c] ss:$16 sps:$4 sm:$0xff]  }
 0x29e   :  { %4358 = vmatprep.subr.bf16.mxu0 %v6507_v9  ;;  %v6611_v15 = vld [vmem:[#allocation8 + $0x8] sm:$0xff]  }
 0x29f   :  { %4418 = vmatmul.mubr.bf16.vlgmr.msra.gmra.mxu1 %v6961_v27  ;;  %v6520_v27 = vld [vmem:[#allocation7 + $0x688] ss:$16 sps:$4 sm:$0xff]  }
 0x2a0   :  { %4472 = vmatpush1.bf16.msra.mxu1 %v6502_v10  ;;  %4503 = vmatprep.mubr.bf16.mxu1 %v6803_v54  ;;  %v6528_v54 = vld [vmem:[#allocation7 + $0x66c] ss:$16 sps:$4 sm:$0xff]   ;;  %v6568_v9 = vld [vmem:[#allocation7 + $0x428] ss:$16 sps:$4 sm:$0xff]   ;;  %v6612_v10 = vld [vmem:[#allocation8 + $0x40] sm:$0xff]  }
 0x2a1   :  { %4359 = vmatpush2.bf16.msra.mxu0 %v6505_v11  ;;  %4473 = vmatprep.subr.bf16.mxu1 %v6510_v38  ;;  %v6573_v11 = vld [vmem:[#allocation7 + $0x40c] ss:$16 sps:$4 sm:$0xff]   ;;  %v6613_v38 = vld [vmem:[#allocation8] sm:$0xff]  }
 0x2a2   :  { %4360 = vmatprep.subr.bf16.mxu0 %v6513_v47  ;;  %v6571_v47 = vld [vmem:[#allocation7 + $0x408] ss:$16 sps:$4 sm:$0xff]  }
 0x2a4   :  { %4474 = vmatpush1.bf16.msra.mxu1 %v6508_v14  ;;  %v6576_v14 = vld [vmem:[#allocation7 + $0x5ec] ss:$16 sps:$4 sm:$0xff]  }
 0x2a5   :  { %4361 = vmatpush2.bf16.msra.mxu0 %v6511_v16  ;;  %4475 = vmatprep.subr.bf16.mxu1 %v6516_v32  ;;  %v6574_v16 = vld [vmem:[#allocation7 + $0x5e8] ss:$16 sps:$4 sm:$0xff]   ;;  %v6579_v32 = vld [vmem:[#allocation7 + $0x5cc] ss:$16 sps:$4 sm:$0xff]  }
 0x2a6   :  { %4362 = vmatprep.subr.bf16.mxu0 %v6519_v56  ;;  %v6577_v56 = vld [vmem:[#allocation7 + $0x5c8] ss:$16 sps:$4 sm:$0xff]  }
 0x2a8   :  { %4476 = vmatpush1.bf16.msra.mxu1 %v6514_v18  ;;  %v6582_v18 = vld [vmem:[#allocation7 + $0x5ac] ss:$16 sps:$4 sm:$0xff]  }
 0x2a9   :  { %4363 = vmatpush2.bf16.msra.mxu0 %v6517_v19  ;;  %4477 = vmatprep.subr.bf16.mxu1 %v6522_v20  ;;  %v6580_v19 = vld [vmem:[#allocation7 + $0x5a8] ss:$16 sps:$4 sm:$0xff]   ;;  %v6585_v20 = vld [vmem:[#allocation7 + $0x58c] ss:$16 sps:$4 sm:$0xff]  }
 0x2aa   :  { %4364 = vmatprep.subr.bf16.mxu0 %v6525_v13  ;;  %v6583_v13 = vld [vmem:[#allocation7 + $0x588] ss:$16 sps:$4 sm:$0xff]  }
 0x2ac   :  { %4478 = vmatpush1.bf16.msra.mxu1 %v6520_v27  ;;  %v6588_v27 = vld [vmem:[#allocation7 + $0x56c] ss:$16 sps:$4 sm:$0xff]  }
 0x2ad   :  { %4365 = vmatpush2.bf16.msra.mxu0 %v6523_v40  ;;  %4479 = vmatprep.subr.bf16.mxu1 %v6528_v54  ;;  %v6586_v40 = vld [vmem:[#allocation7 + $0x568] ss:$16 sps:$4 sm:$0xff]   ;;  %v6591_v54 = vld [vmem:[#allocation7 + $0x54c] ss:$16 sps:$4 sm:$0xff]  }
 0x2ae   :  { %4366 = vmatprep.subr.bf16.mxu0 %v6531_v8  ;;  %v6589_v8 = vld [vmem:[#allocation7 + $0x548] ss:$16 sps:$4 sm:$0xff]  }
 0x2b0   :  { %4480 = vmatpush1.bf16.msra.mxu1 %v6526_v5  ;;  %v6594_v5 = vld [vmem:[#allocation7 + $0x52c] ss:$16 sps:$4 sm:$0xff]  }
 0x2b1   :  { %4367 = vmatpush2.bf16.msra.mxu0 %v6529_v21  ;;  %4481 = vmatprep.subr.bf16.mxu1 %v6534_v22  ;;  %v6592_v21 = vld [vmem:[#allocation7 + $0x528] ss:$16 sps:$4 sm:$0xff]   ;;  %v6597_v22 = vld [vmem:[#allocation7 + $0x50c] ss:$16 sps:$4 sm:$0xff]  }
 0x2b2   :  { %4368 = vmatprep.subr.bf16.mxu0 %v6537_v60  ;;  %v6595_v60 = vld [vmem:[#allocation7 + $0x508] ss:$16 sps:$4 sm:$0xff]  }
 0x2b4   :  { %4482 = vmatpush1.bf16.msra.mxu1 %v6532_v12  ;;  %v6614_v12 = vld [vmem:[#allocation8 + $0xf8] sm:$0xff]  }
 0x2b5   :  { %4369 = vmatpush2.bf16.msra.mxu0 %v6535_v25  ;;  %4483 = vmatprep.subr.bf16.mxu1 %v6540_v26  ;;  %v6615_v25 = vld [vmem:[#allocation8 + $0xb8] sm:$0xff]   ;;  %v6616_v26 = vld [vmem:[#allocation8 + $0xf0] sm:$0xff]  }
 0x2b6   :  { %4370 = vmatprep.subr.bf16.mxu0 %v6543_v55  ;;  %v6617_v55 = vld [vmem:[#allocation8 + $0xb0] sm:$0xff]  }
 0x2b8   :  { %4484 = vmatpush1.bf16.msra.mxu1 %v6538_v28  ;;  %v6618_v28 = vld [vmem:[#allocation8 + $0xe8] sm:$0xff]  }
 0x2b9   :  { %4371 = vmatpush2.bf16.msra.mxu0 %v6541_v30  ;;  %4485 = vmatprep.subr.bf16.mxu1 %v6546_v31  ;;  %v6619_v30 = vld [vmem:[#allocation8 + $0xa8] sm:$0xff]   ;;  %v6620_v31 = vld [vmem:[#allocation8 + $0xe0] sm:$0xff]  }
 0x2ba   :  { %4372 = vmatprep.subr.bf16.mxu0 %v6549_v35  ;;  %v6621_v35 = vld [vmem:[#allocation8 + $0xa0] sm:$0xff]  }
 0x2bc   :  { %4486 = vmatpush1.bf16.msra.mxu1 %v6544_v36  ;;  %v4204_v36 = vpop.f32.mrf.mxu1 }
 0x2bd   :  { %4373 = vmatpush2.bf16.msra.mxu0 %v6547_v37  ;;  %5691 = vmatprep.subr.bf16.mxu1 %v6598_v39 }
 0x2be   :  { %4428 = vmatprep.subr.bf16.mxu0 %v6552_v42  ;;  %v4206_v37 = vpop.f32.mrf.mxu1 }
 0x2bf   :  { %4504 = vmatmul.mubr.bf16.vlgmr.msra.gmra.mxu1 %v6975_v29  ;;  %v6561_v29 = vld [vmem:[#allocation7 + $0x48c] ss:$16 sps:$4 sm:$0xff]  }
 0x2c0   :  { %4375 = vmatmul.mubr.bf16.vlgmr.msra.gmra.mxu0 %v6943_v24  ;;  %5692 = vmatpush3.bf16.msra.mxu1 %v6599_v43  ;;  %v6605_v24 = vld [vmem:[#allocation8 + $0x20] sm:$0xff]   ;;  %v4208_v39 = vpop.f32.mrf.mxu1 }
 0x2c1   :  { %4429 = vmatpush1.bf16.msra.mxu0 %v6550_v46  ;;  %4460 = vmatprep.mubr.bf16.mxu0 %v6967_v45  ;;  %v6564_v45 = vld [vmem:[#allocation7 + $0x46c] ss:$16 sps:$4 sm:$0xff]  }
 0x2c2   :  { %4430 = vmatprep.subr.bf16.mxu0 %v6555_v48  ;;  %5693 = vmatprep.subr.bf16.mxu1 %v6600_v51  ;;  %v4210_v42 = vpop.f32.mrf.mxu1  ;;  %v6985_v48 = vld [vmem:[#allocation11 + $0x1] ss:$4 sm:$0xf] }
 0x2c4   :  { %5694 = vmatpush3.bf16.msra.mxu1 %v6601_v52 }
 0x2c5   :  { %4431 = vmatpush1.bf16.msra.mxu0 %v6553_v53  ;;  %5695 = vmatprep.subr.bf16.mxu1 %v6602_v17  ;;  %v3037_v53 = vrot.slane %v6985_v48, %v515_v41  ;;  %v3033_v17 = vrot.slane %v6985_v48, %v511_v34 }
 0x2c6   :  { %4432 = vmatprep.subr.bf16.mxu0 %v6558_v50 }
 0x2c8   :  { %5696 = vmatpush3.bf16.msra.mxu1 %v6603_v57 }
 0x2c9   :  { %4433 = vmatpush1.bf16.msra.mxu0 %v6556_v59  ;;  %5697 = vmatprep.subr.bf16.mxu1 %v6604_v23  ;;  %v6622_v59 = vld [vmem:[#allocation8 + $0xd8] sm:$0xff]   ;;  %v4207_v23 = vadd.f32 %v4206_v37, %v3037_v53 }
 0x2ca   :  { %4434 = vmatprep.subr.bf16.mxu0 %v6561_v29  ;;  %v4209_v29 = vadd.f32 %v4208_v39, %v3033_v17 }
 0x2cc   :  { %5698 = vmatpush3.bf16.msra.mxu1 %v6605_v24  ;;  %v6623_v24 = vld [vmem:[#allocation8 + $0x98] sm:$0xff]  }
 0x2cd   :  { %4435 = vmatpush1.bf16.msra.mxu0 %v6559_v61  ;;  %5699 = vmatprep.subr.bf16.mxu1 %v6606_v62  ;;  %v4205_v61 = vadd.f32 %v4204_v36, %v3033_v17  ;;  %v3041_v36 = vrot.slane %v6985_v48, %v519_v58 }
 0x2ce   :  { %4436 = vmatprep.subr.bf16.mxu0 %v6564_v45  ;;  %v4211_v45 = vadd.f32 %v4210_v42, %v3037_v53 }
 0x2d0   :  { %5700 = vmatpush3.bf16.msra.mxu1 %v6607_v63 }
 0x2d1   :  { %4437 = vmatpush1.bf16.msra.mxu0 %v6562_v0  ;;  %5701 = vmatprep.subr.bf16.mxu1 %v6608_v1 }
 0x2d2   :  { %4438 = vmatprep.subr.bf16.mxu0 %v6567_v2 }
 0x2d4   :  { %5702 = vmatpush3.bf16.msra.mxu1 %v6609_v3  ;;  %v6624_v3 = vld [vmem:[#allocation8 + $0xd0] sm:$0xff]  }
 0x2d5   :  { %4439 = vmatpush1.bf16.msra.mxu0 %v6565_v4  ;;  %5703 = vmatprep.subr.bf16.mxu1 %v6610_v6 }
 0x2d6   :  { %4440 = vmatprep.subr.bf16.mxu0 %v6570_v7  ;;  %v6625_v7 = vld [vmem:[#allocation8 + $0x90] sm:$0xff]  }
 0x2d8   :  { %5704 = vmatpush3.bf16.msra.mxu1 %v6611_v15 }
 0x2d9   :  { %4441 = vmatpush1.bf16.msra.mxu0 %v6568_v9  ;;  %5705 = vmatprep.subr.bf16.mxu1 %v6612_v10 }
 0x2da   :  { %4442 = vmatprep.subr.bf16.mxu0 %v6573_v11 }
 0x2dc   :  { %5706 = vmatpush3.bf16.msra.mxu1 %v6613_v38 }
 0x2dd   :  { %4443 = vmatpush1.bf16.msra.mxu0 %v6571_v47 }
 0x2de   :  { %4444 = vmatprep.subr.bf16.mxu0 %v6576_v14 }
 0x2e1   :  { %4445 = vmatpush2.bf16.msra.mxu0 %v6574_v16  ;;  %v6626_v16 = vld [vmem:[#allocation8 + $0xc8] sm:$0xff]  }
 0x2e2   :  { %4446 = vmatprep.subr.bf16.mxu0 %v6579_v32 }
 0x2e5   :  { %4447 = vmatpush2.bf16.msra.mxu0 %v6577_v56  ;;  %v6627_v56 = vld [vmem:[#allocation8 + $0x88] sm:$0xff]  }
 0x2e6   :  { %4448 = vmatprep.subr.bf16.mxu0 %v6582_v18 }
 0x2e9   :  { %4449 = vmatpush2.bf16.msra.mxu0 %v6580_v19 }
 0x2ea   :  { %4450 = vmatprep.subr.bf16.mxu0 %v6585_v20 }
 0x2ed   :  { %4451 = vmatpush2.bf16.msra.mxu0 %v6583_v13 }
 0x2ee   :  { %4452 = vmatprep.subr.bf16.mxu0 %v6588_v27  ;;  %v6628_v27 = vld [vmem:[#allocation8 + $0xc0] sm:$0xff]  }
 0x2f1   :  { %4453 = vmatpush2.bf16.msra.mxu0 %v6586_v40 }
 0x2f2   :  { %4454 = vmatprep.subr.bf16.mxu0 %v6591_v54  ;;  %v6629_v54 = vld [vmem:[#allocation8 + $0x80] sm:$0xff]  }
 0x2f5   :  { %4455 = vmatpush2.bf16.msra.mxu0 %v6589_v8 }
 0x2f6   :  { %4456 = vmatprep.subr.bf16.mxu0 %v6594_v5  ;;  %v6630_v5 = vld [vmem:[#allocation10 + $0x38] sm:$0xff]  }
 0x2f9   :  { %4457 = vmatpush2.bf16.msra.mxu0 %v6592_v21  ;;  %v6804_v21 = vmov 0.0  }
 0x2fa   :  { %4458 = vmatprep.subr.bf16.mxu0 %v6597_v22  ;;  %5744 = vmatprep.subr.bf16.mxu1 %v6804_v21  ;;  %v6631_v22 = vld [vmem:[#allocation10 + $0x30] sm:$0xff]  }
 0x2fd   :  { %4459 = vmatpush2.bf16.msra.mxu0 %v6595_v60  ;;  %v6632_v60 = vld [vmem:[#allocation10 + $0x28] sm:$0xff]  }
 0x2fe   :  { %5713 = vmatprep.subr.bf16.mxu0 %v6614_v12  ;;  %v6633_v12 = vld [vmem:[#allocation10 + $0x20] sm:$0xff]  }
 0x300   :  { %4461 = vmatmul.mubr.bf16.vlgmr.msra.gmra.mxu0 %v6969_v49  ;;  %v4247_v49 = vpop.f32.mrf.mxu0 }
 0x301   :  { %5714 = vmatpush3.bf16.msra.mxu0 %v6615_v25  ;;  %v4248_v1 = vadd.f32 %v4247_v49, %v4205_v61 }
 0x302   :  { %5715 = vmatprep.subr.bf16.mxu0 %v6616_v26  ;;  %v4249_v43 = vpop.f32.mrf.mxu0 }
 0x303   :  { %v4250_v63 = vadd.f32 %v4249_v43, %v4207_v23 }
 0x304   :  { %v4251_v51 = vpop.f32.mrf.mxu0 }
 0x305   :  { %5716 = vmatpush3.bf16.msra.mxu0 %v6617_v55  ;;  %v4252_v0 = vadd.f32 %v4251_v51, %v4209_v29 }
 0x306   :  { %5717 = vmatprep.subr.bf16.mxu0 %v6618_v28  ;;  %v4253_v50 = vpop.f32.mrf.mxu0 }
 0x307   :  { %v4254_v4 = vadd.f32 %v4253_v50, %v4211_v45 }
 0x309   :  { %5718 = vmatpush3.bf16.msra.mxu0 %v6619_v30 }
 0x30a   :  { %5719 = vmatprep.subr.bf16.mxu0 %v6620_v31  ;;  %v3045_v31 = vrot.slane %v6985_v48, %v523_v44 }
 0x30d   :  { %5720 = vmatpush3.bf16.msra.mxu0 %v6621_v35 }
 0x30e   :  { %5721 = vmatprep.subr.bf16.mxu0 %v6622_v59 }
 0x311   :  { %5722 = vmatpush3.bf16.msra.mxu0 %v6623_v24 }
 0x312   :  { %5723 = vmatprep.subr.bf16.mxu0 %v6624_v3 }
 0x315   :  { %5724 = vmatpush3.bf16.msra.mxu0 %v6625_v7  ;;  %v6634_v7 = vld [vmem:[#allocation10 + $0x18] sm:$0xff]  }
 0x316   :  { %5725 = vmatprep.subr.bf16.mxu0 %v6626_v16 }
 0x319   :  { %5726 = vmatpush3.bf16.msra.mxu0 %v6627_v56  ;;  %v5574_v56 = vld [vmem:[#allocation11 + $0x2] ss:$0 sm:$0xff] }
 0x31a   :  { %5727 = vmatprep.subr.bf16.mxu0 %v6628_v27 }
 0x31d   :  { %5728 = vmatpush3.bf16.msra.mxu0 %v6629_v54 }
 0x31f   :  { %v4290_v46 = vpop.f32.mrf.mxu1 }
 0x320   :  { %v4291_v15 = vadd.f32 %v4290_v46, %v4248_v1 }
 0x321   :  { %v4292_v52 = vpop.f32.mrf.mxu1 }
 0x322   :  { %v4293_v6 = vadd.f32 %v4292_v52, %v4250_v63 }
 0x323   :  { %v4294_v57 = vpop.f32.mrf.mxu1 }
 0x324   :  { %v4295_v34 = vadd.f32 %v4294_v57, %v4252_v0 }
 0x325   :  { %v4296_v2 = vpop.f32.mrf.mxu1 }
 0x326   :  { %v4297_v10 = vadd.f32 %v4296_v2, %v4254_v4 }
 0x340   :  { %v4333_v62 = vpop.f32.mrf.mxu0 }
 0x341   :  { %v4334_v47 = vadd.f32 %v4333_v62, %v4291_v15  ;;  %v6635_v15 = vld [vmem:[#allocation10 + $0x10] sm:$0xff]  }
 0x342   :  { %v4335_v41 = vpop.f32.mrf.mxu0 }
 0x343   :  { %v4336_v11 = vadd.f32 %v4335_v41, %v4293_v6  ;;  %v4514_v13 = vmax.f32 %v4334_v47, 0.0 }
 0x344   :  { %v4337_v9 = vpop.f32.mrf.mxu0 }
 0x345   :  { %v4338_v38 = vadd.f32 %v4337_v9, %v4295_v34  ;;  %v4515_v19 = vmax.f32 %v4336_v11, 0.0  ;;  %v6636_v9 = vld [vmem:[#allocation10 + $0x8] sm:$0xff]  }
 0x346   :  { %v4339_v14 = vpop.f32.mrf.mxu0 }
 0x347   :  { %v4340_v32 = vadd.f32 %v4339_v14, %v4297_v10  ;;  %v4518_v18 = vmax.f32 %v4338_v38, 0.0  ;;  %v6637_v10 = vld [vmem:[#allocation10] sm:$0xff]  }
 0x349   :  { %v4519_v20 = vmax.f32 %v4340_v32, 0.0  ;;  %v4522_v8 = vpack.c.bf16 %v4518_v18, %v4514_v13 }
 0x34b   :  { %v4523_v40 = vpack.c.bf16 %v4519_v20, %v4515_v19 }
 0x34d   :  { %4819 = vmatprep.mubr.bf16.mxu1 %v4523_v40 }
 0x34e   :  { %4820 = vmatmul.mubr.bf16.vlgmr.msra.gmra.mxu1 %v4522_v8 }
 0x34f   :  { %5745 = vmatpush3.bf16.msra.mxu1 %v6630_v5  ;;  %5760 = vmatprep.mubr.msk.bf16.mxu1 %vm6805_vm0, %v6804_v21 }
 0x350   :  { %5746 = vmatprep.subr.bf16.mxu1 %v6804_v21 }
 0x353   :  { %5747 = vmatpush3.bf16.msra.mxu1 %v6631_v22 }
 0x354   :  { %5748 = vmatprep.subr.bf16.mxu1 %v6804_v21 }
 0x357   :  { %5749 = vmatpush3.bf16.msra.mxu1 %v6632_v60 }
 0x358   :  { %5750 = vmatprep.subr.bf16.mxu1 %v6804_v21 }
 0x35b   :  { %5751 = vmatpush3.bf16.msra.mxu1 %v6633_v12 }
 0x35c   :  { %5752 = vmatprep.subr.bf16.mxu1 %v6804_v21 }
 0x35f   :  { %v4419_v25 = vpop.f32.mrf.mxu1  ;;  %5753 = vmatpush3.bf16.msra.mxu1 %v6634_v7 }
 0x360   :  { %5754 = vmatprep.subr.bf16.mxu1 %v6804_v21 }
 0x361   :  { %v4421_v26 = vpop.f32.mrf.mxu1 }
 0x363   :  { %v4423_v28 = vpop.f32.mrf.mxu1  ;;  %5755 = vmatpush3.bf16.msra.mxu1 %v6635_v15 }
 0x364   :  { %5756 = vmatprep.subr.bf16.mxu1 %v6804_v21 }
 0x365   :  { %v4425_v35 = vpop.f32.mrf.mxu1 }
 0x367   :  { %5757 = vmatpush3.bf16.msra.mxu1 %v6636_v9 }
 0x368   :  { %5758 = vmatprep.subr.bf16.mxu1 %v6804_v21 }
 0x36b   :  { %5759 = vmatpush3.bf16.msra.mxu1 %v6637_v10 }
 0x37f   :  { %v4505_v39 = vpop.f32.mrf.mxu1 }
 0x380   :  { %v4376_v55 = vpop.f32.mrf.mxu0 }
 0x381   :  { %v4377_v42 = vadd.f32 %v4376_v55, %v3041_v36  ;;  %v4507_v51 = vpop.f32.mrf.mxu1 }
 0x382   :  { %v4378_v30 = vpop.f32.mrf.mxu0 }
 0x383   :  { %v4379_v49 = vadd.f32 %v4378_v30, %v3045_v31  ;;  %v4420_v50 = vadd.f32 %v4419_v25, %v4377_v42  ;;  %v4509_v44 = vpop.f32.mrf.mxu1  ;;  %v5607_v25 = vld [vmem:[#allocation11 + $0x3] ss:$0 sm:$0xff] }
 0x384   :  { %v4380_v37 = vpop.f32.mrf.mxu0 }
 0x385   :  { %v4381_v46 = vadd.f32 %v4380_v37, %v3041_v36  ;;  %v4422_v17 = vadd.f32 %v4421_v26, %v4379_v49  ;;  %v4511_v63 = vpop.f32.mrf.mxu1 }
 0x386   :  { %v4382_v43 = vpop.f32.mrf.mxu0 }
 0x387   :  { %v4383_v53 = vadd.f32 %v4382_v43, %v3045_v31  ;;  %v4424_v23 = vadd.f32 %v4423_v28, %v4381_v46 }
 0x389   :  { %v4426_v61 = vadd.f32 %v4425_v35, %v4383_v53 }
 0x3c0   :  { %v4462_v52 = vpop.f32.mrf.mxu0 }
 0x3c1   :  { %v4463_v29 = vadd.f32 %v4462_v52, %v4420_v50 }
 0x3c2   :  { %v4464_v57 = vpop.f32.mrf.mxu0 }
 0x3c3   :  { %v4465_v59 = vadd.f32 %v4464_v57, %v4422_v17  ;;  %v4506_v0 = vadd.f32 %v4505_v39, %v4463_v29 }
 0x3c4   :  { %v4466_v24 = vpop.f32.mrf.mxu0 }
 0x3c5   :  { %v4467_v33 = vadd.f32 %v4466_v24, %v4424_v23  ;;  %v4508_v48 = vadd.f32 %v4507_v51, %v4465_v59  ;;  %v4516_v4 = vmax.f32 %v4506_v0, 0.0 }
 0x3c6   :  { %v4468_v58 = vpop.f32.mrf.mxu0 }
 0x3c7   :  { %v4510_v62 = vadd.f32 %v4509_v44, %v4467_v33  ;;  %v4469_v45 = vadd.f32 %v4468_v58, %v4426_v61  ;;  %v4517_v41 = vmax.f32 %v4508_v48, 0.0 }
 0x3c9   :  { %v4512_v1 = vadd.f32 %v4511_v63, %v4469_v45  ;;  %v4520_v2 = vmax.f32 %v4510_v62, 0.0 }
 0x3cb   :  { %v4521_v3 = vmax.f32 %v4512_v1, 0.0  ;;  %v4524_v34 = vpack.c.bf16 %v4520_v2, %v4516_v4 }
 0x3cd   :  { %v4525_v6 = vpack.c.bf16 %v4521_v3, %v4517_v41 }
 0x3cf   :  { %4860 = vmatprep.mubr.bf16.mxu0 %v4525_v6 }
 0x3d0   :  { %4861 = vmatmul.mubr.bf16.vlgmr.msra.gmra.mxu0 %v4524_v34 }
 0x40e   :  { %v5707_v11 = vpop.f32.mrf.mxu1 }
 0x410   :  { %v5708_v38 = vpop.f32.mrf.mxu1 }
 0x411   :  { %v5709_v32 = vadd.f32 %v5708_v38, %v5707_v11 }
 0x412   :  { %v5710_v47 = vpop.f32.mrf.mxu1 }
 0x413   :  { %v4822_v27 = vadd.f32 %v5709_v32, %v5574_v56 }
 0x414   :  { %v5711_v14 = vpop.f32.mrf.mxu1 }
 0x415   :  { %v5712_v19 = vadd.f32 %v5711_v14, %v5710_v47 }
 0x417   :  { %v4825_v54 = vadd.f32 %v5712_v19, %v5574_v56 }
 0x490   :  { %v5729_v16 = vpop.f32.mrf.mxu0 }
 0x492   :  { %v5730_v18 = vpop.f32.mrf.mxu0 }
 0x493   :  { %v5731_v20 = vadd.f32 %v5730_v18, %v5729_v16 }
 0x494   :  { %v5732_v13 = vpop.f32.mrf.mxu0 }
 0x495   :  { %v4863_v8 = vadd.f32 %v5731_v20, %v4822_v27 }
 0x496   :  { %v5733_v40 = vpop.f32.mrf.mxu0 }
 0x497   :  { %v5734_v5 = vadd.f32 %v5733_v40, %v5732_v13  ;;  %v4869_v60 = vmax.f32 %v4863_v8, 0.0 }
 0x499   :  { %v4866_v22 = vadd.f32 %v5734_v5, %v4825_v54 }
 0x49b   :  { %v4870_v12 = vmax.f32 %v4866_v22, 0.0 }
 0x49d   :  { %v4871_v21 = vpack.c.bf16 %v4870_v12, %v4869_v60 }
 0x49f   :  { %5761 = vmatmul.mubr.bf16.vlgmr.msra.gmra.mxu1 %v4871_v21 }
 0x55f   :  { %v4975_v26 = vpop.f32.mrf.mxu1 }
 0x560   :  { %v4976_v28 = vadd.f32 %v5607_v25, %v4975_v26 }
 0x561   :  { %v5762_v55 = vpop.f32.mrf.mxu1 }
 0x562   :  { %v4982_v36 = vmax.f32 %v4976_v28, 0.0 }
 0x563   :  { %v4978_v30 = vpop.f32.mrf.mxu1 }
 0x564   :  { %v4979_v31 = vadd.f32 %v5607_v25, %v4978_v30 }
 0x565   :  { %v5763_v35 = vpop.f32.mrf.mxu1 }
 0x566   :  { %v4983_v37 = vmax.f32 %v4979_v31, 0.0 }
 0x568   :  { %v5623_v39 = vpack.c.bf16 %v4983_v37, %v4982_v36 }
 0x56a   :  { %5624 = vst [vmem:[#allocation13] sm:$0xff] %v5623_v39  }
 0x56b   :  { %6770 = shalt.err (!%p6767_p6)
}
 0x56c   :  { %5005 = dma.vmem_to_hbm [thread:$0]  %s5000_s5, 128, %s7020_s6, [#allocation4], %s6793_s7, %s6793_s7, %s6794_s8  }
 0x56d   :  { %6787 = dma.done.wait [#allocation4], 128  }
 0x56e   :  { %6788 = vsyncadd [#allocation4], 4294967168 }
 0x56f   :  { %5009 = vsyncpa [#allocation3], 1 }
 0x570   :  { %5010 = vsyncpa [#allocation6], 1 }
 0x571   :  { %5011 = vsyncpa [#allocation9], 1 }
 0x572   :  { %5012 = vsyncpa [#allocation12], 1 }
 0x573   :  { %5013 = vsyncpa [#allocation4], 1 }

</bundles_post_ra>
